<compile_context>
chip_gen: v6e
topology: v6e:2x2x1
jax: 0.10.0
libtpu: 0.0.40
codegen_flags: <defaults>
</compile_context>

<pallas_src>
import functools

import jax
import jax.numpy as jnp
import numpy as np
from jax import lax
from jax.experimental import pallas as pl
from jax.experimental.pallas import tpu as pltpu


# ----------------------------- Pallas kernel ------------------------------

def _lenet_kernel(x_ref,
                  w1_ref, b1_ref, pr1_ref, pc1_ref,
                  w2_ref, b2_ref, pr2_ref, pc2_ref,
                  w3_ref, b3_ref,
                  fw1_ref, fb1_ref, fw2_ref, fb2_ref,
                  o_ref):
    f32 = jnp.float32
    x = x_ref[0]                                                      # (28, 28)

    # conv1 + tanh : layout (oh, ow*6 + c), spatial 25x25, 6 channels.
    acc = jnp.dot(x[0:25, :], w1_ref[0], preferred_element_type=f32)
    for i in range(1, 4):
        acc = acc + jnp.dot(x[i:i + 25, :], w1_ref[i], preferred_element_type=f32)
    a1 = jnp.tanh(acc + b1_ref[...])                                  # (25, 150)

    # 2x2 avg-pool (floor semantics) via constant pooling matmuls -> (12, 72)
    p1 = jnp.dot(pr1_ref[...], a1, preferred_element_type=f32)        # (12, 150)
    p1 = jnp.dot(p1, pc1_ref[...], preferred_element_type=f32)        # (12, 72)

    # conv2 + tanh : layout (oh, ow*16 + c), spatial 9x9, 16 channels.
    acc = jnp.dot(p1[0:9, :], w2_ref[0], preferred_element_type=f32)
    for i in range(1, 4):
        acc = acc + jnp.dot(p1[i:i + 9, :], w2_ref[i], preferred_element_type=f32)
    a2 = jnp.tanh(acc + b2_ref[...])                                  # (9, 144)

    # 2x2 avg-pool -> (4, 64)
    p2 = jnp.dot(pr2_ref[...], a2, preferred_element_type=f32)        # (4, 144)
    p2 = jnp.dot(p2, pc2_ref[...], preferred_element_type=f32)        # (4, 64)

    # conv3 + tanh -> (1, 120)
    acc = jnp.dot(p2[0:1, :], w3_ref[0], preferred_element_type=f32)
    for i in range(1, 4):
        acc = acc + jnp.dot(p2[i:i + 1, :], w3_ref[i], preferred_element_type=f32)
    a3 = jnp.tanh(acc + b3_ref[...])                                  # (1, 120)

    # fc1 + tanh
    h = jnp.tanh(jnp.dot(a3, fw1_ref[...], preferred_element_type=f32)
                 + fb1_ref[...])                                      # (1, 84)

    # fc2 (lane-padded to 128; padded logits = -1e30) + softmax
    logits = jnp.dot(h, fw2_ref[...], preferred_element_type=f32) + fb2_ref[...]
    m = jnp.max(logits, axis=-1, keepdims=True)
    e = jnp.exp(logits - m)
    o_ref[0] = e / jnp.sum(e, axis=-1, keepdims=True)                 # (1, 128)


# ------------------------ one-time weight preparation -----------------------

def _band_matrix(w_row, w_in, ow):
    # w_row: (KW, Cin, Cout).  Returns M of shape (w_in*Cin, ow*Cout) with
    # M[w*Cin + c, o*Cout + d] = w_row[w - o, c, d] if 0 <= w - o < KW else 0,
    # so that (act_rows @ M) performs the width/channel part of the convolution.
    kw, cin, cout = w_row.shape
    t = np.zeros((kw, w_in, ow), np.float32)
    for j in range(kw):
        for o in range(ow):
            t[j, o + j, o] = 1.0
    m = jnp.einsum("jwo,jcd->wcod", jnp.asarray(t), w_row.astype(jnp.float32))
    return m.reshape(w_in * cin, ow * cout)


def _row_pool_matrix(ph, h_in):
    p = np.zeros((ph, h_in), np.float32)
    for r in range(ph):
        p[r, 2 * r] = 0.5
        p[r, 2 * r + 1] = 0.5
    return jnp.asarray(p)


def _col_pool_matrix(w_groups, c):
    pw = w_groups // 2
    p = np.zeros((w_groups * c, pw * c), np.float32)
    for o in range(pw):
        for dw in range(2):
            w = 2 * o + dw
            for ch in range(c):
                p[w * c + ch, o * c + ch] = 0.5
    return jnp.asarray(p)


def prepare_params(params):
    w1, w2, w3 = params["w1"], params["w2"], params["w3"]
    return dict(
        w1b=jnp.stack([_band_matrix(w1[i], 28, 25) for i in range(4)]),  # (4,28,150)
        b1r=jnp.tile(params["b1"], 25).reshape(1, 150),
        pr1=_row_pool_matrix(12, 25),                                    # (12,25)
        pc1=_col_pool_matrix(25, 6),                                     # (150,72)
        w2b=jnp.stack([_band_matrix(w2[i], 12, 9) for i in range(4)]),   # (4,72,144)
        b2r=jnp.tile(params["b2"], 9).reshape(1, 144),
        pr2=_row_pool_matrix(4, 9),                                      # (4,9)
        pc2=_col_pool_matrix(9, 16),                                     # (144,64)
        w3b=jnp.stack([w3[i].reshape(64, 120) for i in range(4)]),       # (4,64,120)
        b3r=params["b3"].reshape(1, 120),
        fw1=params["fw1"],                                               # (120,84)
        fb1=params["fb1"],                                               # (1,84)
        fw2p=jnp.concatenate(
            [params["fw2"], jnp.zeros((84, 118), jnp.float32)], axis=1), # (84,128)
        fb2p=jnp.concatenate(
            [params["fb2"], jnp.full((1, 118), -1e30, jnp.float32)], axis=1),  # (1,128)
    )


# ----------------------------- forward wrapper ------------------------------

def _resident_spec(shape):
    nd = len(shape)
    return pl.BlockSpec(shape, lambda b, _nd=nd: (0,) * _nd)


@jax.jit
def lenet_forward(prepped, x_nchw):
    n = x_nchw.shape[0]
    x = x_nchw.astype(jnp.float32).reshape(n, 28, 28)   # Cin == 1
    weights = (prepped["w1b"], prepped["b1r"], prepped["pr1"], prepped["pc1"],
               prepped["w2b"], prepped["b2r"], prepped["pr2"], prepped["pc2"],
               prepped["w3b"], prepped["b3r"],
               prepped["fw1"], prepped["fb1"], prepped["fw2p"], prepped["fb2p"])
    in_specs = ([pl.BlockSpec((1, 28, 28), lambda b: (b, 0, 0))]
                + [_resident_spec(w.shape) for w in weights])
    out = pl.pallas_call(
        _lenet_kernel,
        out_shape=jax.ShapeDtypeStruct((n, 1, 128), jnp.float32),
        grid=(n,),
        in_specs=in_specs,
        out_specs=pl.BlockSpec((1, 1, 128), lambda b: (b, 0, 0)),
        compiler_params=pltpu.CompilerParams(dimension_semantics=("parallel",)),
    )(x, *weights)
    return out.reshape(n, 128)[:, :10]


# ----------------------------- init & reference ------------------------------

def init_params(key):
    def uinit(k, shape, fan_in):
        bound = 1.0 / float(np.sqrt(fan_in))
        return jax.random.uniform(k, shape, jnp.float32, -bound, bound)

    ks = jax.random.split(key, 10)
    return {
        "w1": uinit(ks[0], (4, 4, 1, 6), 4 * 4 * 1),
        "b1": uinit(ks[1], (6,), 4 * 4 * 1),
        "w2": uinit(ks[2], (4, 4, 6, 16), 4 * 4 * 6),
        "b2": uinit(ks[3], (16,), 4 * 4 * 6),
        "w3": uinit(ks[4], (4, 4, 16, 120), 4 * 4 * 16),
        "b3": uinit(ks[5], (120,), 4 * 4 * 16),
        "fw1": uinit(ks[6], (120, 84), 120),
        "fb1": uinit(ks[7], (1, 84), 120),
        "fw2": uinit(ks[8], (84, 10), 84),
        "fb2": uinit(ks[9], (1, 10), 84),
    }


def lenet_reference(params, x_nchw):
    # Pure-JAX reference (validates conv / pool / softmax semantics).
    nb = x_nchw.shape[0]
    x = jnp.transpose(x_nchw, (0, 2, 3, 1)).astype(jnp.float32)
    dn = ("NHWC", "HWIO", "NHWC")

    def conv(x, w, b):
        y = lax.conv_general_dilated(x, w, (1, 1), "VALID", dimension_numbers=dn)
        return jnp.tanh(y + b)

    def pool(x):
        n, h, w, c = x.shape
        oh, ow = h // 2, w // 2
        return x[:, :2 * oh, :2 * ow, :].reshape(n, oh, 2, ow, 2, c).mean(axis=(2, 4))

    x = pool(conv(x, params["w1"], params["b1"]))
    x = pool(conv(x, params["w2"], params["b2"]))
    x = conv(x, params["w3"], params["b3"]).reshape(nb, 120)
    x = jnp.tanh(x @ params["fw1"] + params["fb1"])
    x = x @ params["fw2"] + params["fb2"]
    return jax.nn.softmax(x, axis=1)


if __name__ == "__main__":
    key = jax.random.PRNGKey(0)
    params = init_params(key)
    # Input consistent with the module: 1 channel, 28x28 so conv3 yields 1x1x120.
    x = jax.random.normal(jax.random.fold_in(key, 999), (2, 1, 28, 28), dtype=jnp.float32)

    prepped = prepare_params(params)
    out = lenet_forward(prepped, x)
    out = jax.block_until_ready(out)

    ref = lenet_reference(params, x)
    assert out.shape == (2, 10)
    np.testing.assert_allclose(np.asarray(out), np.asarray(ref), atol=1e-4, rtol=1e-4)
    np.testing.assert_allclose(np.asarray(out).sum(axis=1), np.ones(2), atol=1e-5)
    print("KERNEL_OK")
</pallas_src>

<mosaic_0001>
module attributes {stable_mosaic.version = 11 : i64} {
  func.func @_lenet_kernel(%arg0: i32, %arg1: memref<1x28x28xf32, #tpu.memory_space<vmem>>, %arg2: memref<4x28x150xf32, #tpu.memory_space<vmem>>, %arg3: memref<1x150xf32, #tpu.memory_space<vmem>>, %arg4: memref<12x25xf32, #tpu.memory_space<vmem>>, %arg5: memref<150x72xf32, #tpu.memory_space<vmem>>, %arg6: memref<4x72x144xf32, #tpu.memory_space<vmem>>, %arg7: memref<1x144xf32, #tpu.memory_space<vmem>>, %arg8: memref<4x9xf32, #tpu.memory_space<vmem>>, %arg9: memref<144x64xf32, #tpu.memory_space<vmem>>, %arg10: memref<4x64x120xf32, #tpu.memory_space<vmem>>, %arg11: memref<1x120xf32, #tpu.memory_space<vmem>>, %arg12: memref<120x84xf32, #tpu.memory_space<vmem>>, %arg13: memref<1x84xf32, #tpu.memory_space<vmem>>, %arg14: memref<84x128xf32, #tpu.memory_space<vmem>>, %arg15: memref<1x128xf32, #tpu.memory_space<vmem>>, %arg16: memref<1x1x128xf32, #tpu.memory_space<vmem>>) attributes {dimension_semantics = [#tpu.dimension_semantics<parallel>], iteration_bounds = array<i64: 2>, scalar_prefetch = 0 : i64, scratch_operands = 0 : i64, tpu.core_type = #tpu.core_type<tc>, window_params = [{transform_indices = @transform_0, window_bounds = array<i64: 1, 28, 28>}, {pipeline_mode = #tpu.pipeline_mode<synchronous>, transform_indices = @transform_1, window_bounds = array<i64: 4, 28, 150>}, {pipeline_mode = #tpu.pipeline_mode<synchronous>, transform_indices = @transform_2, window_bounds = array<i64: 1, 150>}, {pipeline_mode = #tpu.pipeline_mode<synchronous>, transform_indices = @transform_3, window_bounds = array<i64: 12, 25>}, {pipeline_mode = #tpu.pipeline_mode<synchronous>, transform_indices = @transform_4, window_bounds = array<i64: 150, 72>}, {pipeline_mode = #tpu.pipeline_mode<synchronous>, transform_indices = @transform_5, window_bounds = array<i64: 4, 72, 144>}, {pipeline_mode = #tpu.pipeline_mode<synchronous>, transform_indices = @transform_6, window_bounds = array<i64: 1, 144>}, {pipeline_mode = #tpu.pipeline_mode<synchronous>, transform_indices = @transform_7, window_bounds = array<i64: 4, 9>}, {pipeline_mode = #tpu.pipeline_mode<synchronous>, transform_indices = @transform_8, window_bounds = array<i64: 144, 64>}, {pipeline_mode = #tpu.pipeline_mode<synchronous>, transform_indices = @transform_9, window_bounds = array<i64: 4, 64, 120>}, {pipeline_mode = #tpu.pipeline_mode<synchronous>, transform_indices = @transform_10, window_bounds = array<i64: 1, 120>}, {pipeline_mode = #tpu.pipeline_mode<synchronous>, transform_indices = @transform_11, window_bounds = array<i64: 120, 84>}, {pipeline_mode = #tpu.pipeline_mode<synchronous>, transform_indices = @transform_12, window_bounds = array<i64: 1, 84>}, {pipeline_mode = #tpu.pipeline_mode<synchronous>, transform_indices = @transform_13, window_bounds = array<i64: 84, 128>}, {pipeline_mode = #tpu.pipeline_mode<synchronous>, transform_indices = @transform_14, window_bounds = array<i64: 1, 128>}, {transform_indices = @transform_15, window_bounds = array<i64: 1, 1, 128>}]} {
    %c0 = arith.constant 0 : index
    %c0_0 = arith.constant 0 : index
    %c0_1 = arith.constant 0 : index
    %0 = vector.load %arg1[%c0, %c0_0, %c0_1] : memref<1x28x28xf32, #tpu.memory_space<vmem>>, vector<1x28x28xf32>
    %1 = vector.shape_cast %0 : vector<1x28x28xf32> to vector<28x28xf32>
    %2 = vector.extract_strided_slice %1 {offsets = [0, 0], sizes = [25, 28], strides = [1, 1]} : vector<28x28xf32> to vector<25x28xf32>
    %c0_2 = arith.constant 0 : index
    %c0_3 = arith.constant 0 : index
    %c0_4 = arith.constant 0 : index
    %3 = vector.load %arg2[%c0_2, %c0_3, %c0_4] : memref<4x28x150xf32, #tpu.memory_space<vmem>>, vector<1x28x150xf32>
    %4 = vector.shape_cast %3 : vector<1x28x150xf32> to vector<28x150xf32>
    %cst = arith.constant dense<0.000000e+00> : vector<25x150xf32>
    %5 = tpu.matmul %2, %4, %cst {dimension_numbers = #tpu.dot_dimension_numbers<[1], [0], [0], [1], [0, 0, 1, 1], [], []>} : vector<25x28xf32>, vector<28x150xf32>, vector<25x150xf32> -> vector<25x150xf32>
    %6 = vector.extract_strided_slice %1 {offsets = [1, 0], sizes = [25, 28], strides = [1, 1]} : vector<28x28xf32> to vector<25x28xf32>
    %c1 = arith.constant 1 : index
    %c0_5 = arith.constant 0 : index
    %c0_6 = arith.constant 0 : index
    %7 = vector.load %arg2[%c1, %c0_5, %c0_6] : memref<4x28x150xf32, #tpu.memory_space<vmem>>, vector<1x28x150xf32>
    %8 = vector.shape_cast %7 : vector<1x28x150xf32> to vector<28x150xf32>
    %cst_7 = arith.constant dense<0.000000e+00> : vector<25x150xf32>
    %9 = tpu.matmul %6, %8, %cst_7 {dimension_numbers = #tpu.dot_dimension_numbers<[1], [0], [0], [1], [0, 0, 1, 1], [], []>} : vector<25x28xf32>, vector<28x150xf32>, vector<25x150xf32> -> vector<25x150xf32>
    %10 = arith.addf %5, %9 : vector<25x150xf32>
    %11 = vector.extract_strided_slice %1 {offsets = [2, 0], sizes = [25, 28], strides = [1, 1]} : vector<28x28xf32> to vector<25x28xf32>
    %c2 = arith.constant 2 : index
    %c0_8 = arith.constant 0 : index
    %c0_9 = arith.constant 0 : index
    %12 = vector.load %arg2[%c2, %c0_8, %c0_9] : memref<4x28x150xf32, #tpu.memory_space<vmem>>, vector<1x28x150xf32>
    %13 = vector.shape_cast %12 : vector<1x28x150xf32> to vector<28x150xf32>
    %cst_10 = arith.constant dense<0.000000e+00> : vector<25x150xf32>
    %14 = tpu.matmul %11, %13, %cst_10 {dimension_numbers = #tpu.dot_dimension_numbers<[1], [0], [0], [1], [0, 0, 1, 1], [], []>} : vector<25x28xf32>, vector<28x150xf32>, vector<25x150xf32> -> vector<25x150xf32>
    %15 = arith.addf %10, %14 : vector<25x150xf32>
    %16 = vector.extract_strided_slice %1 {offsets = [3, 0], sizes = [25, 28], strides = [1, 1]} : vector<28x28xf32> to vector<25x28xf32>
    %c3 = arith.constant 3 : index
    %c0_11 = arith.constant 0 : index
    %c0_12 = arith.constant 0 : index
    %17 = vector.load %arg2[%c3, %c0_11, %c0_12] : memref<4x28x150xf32, #tpu.memory_space<vmem>>, vector<1x28x150xf32>
    %18 = vector.shape_cast %17 : vector<1x28x150xf32> to vector<28x150xf32>
    %cst_13 = arith.constant dense<0.000000e+00> : vector<25x150xf32>
    %19 = tpu.matmul %16, %18, %cst_13 {dimension_numbers = #tpu.dot_dimension_numbers<[1], [0], [0], [1], [0, 0, 1, 1], [], []>} : vector<25x28xf32>, vector<28x150xf32>, vector<25x150xf32> -> vector<25x150xf32>
    %20 = arith.addf %15, %19 : vector<25x150xf32>
    %c0_14 = arith.constant 0 : index
    %c0_15 = arith.constant 0 : index
    %21 = vector.load %arg3[%c0_14, %c0_15] : memref<1x150xf32, #tpu.memory_space<vmem>>, vector<1x150xf32>
    %22 = vector.broadcast %21 : vector<1x150xf32> to vector<25x150xf32>
    %23 = arith.addf %20, %22 : vector<25x150xf32>
    %24 = math.tanh %23 : vector<25x150xf32>
    %c0_16 = arith.constant 0 : index
    %c0_17 = arith.constant 0 : index
    %25 = vector.load %arg4[%c0_16, %c0_17] : memref<12x25xf32, #tpu.memory_space<vmem>>, vector<12x25xf32>
    %cst_18 = arith.constant dense<0.000000e+00> : vector<12x150xf32>
    %26 = tpu.matmul %25, %24, %cst_18 {dimension_numbers = #tpu.dot_dimension_numbers<[1], [0], [0], [1], [0, 0, 1, 1], [], []>} : vector<12x25xf32>, vector<25x150xf32>, vector<12x150xf32> -> vector<12x150xf32>
    %c0_19 = arith.constant 0 : index
    %c0_20 = arith.constant 0 : index
    %27 = vector.load %arg5[%c0_19, %c0_20] : memref<150x72xf32, #tpu.memory_space<vmem>>, vector<150x72xf32>
    %cst_21 = arith.constant dense<0.000000e+00> : vector<12x72xf32>
    %28 = tpu.matmul %26, %27, %cst_21 {dimension_numbers = #tpu.dot_dimension_numbers<[1], [0], [0], [1], [0, 0, 1, 1], [], []>} : vector<12x150xf32>, vector<150x72xf32>, vector<12x72xf32> -> vector<12x72xf32>
    %29 = vector.extract_strided_slice %28 {offsets = [0, 0], sizes = [9, 72], strides = [1, 1]} : vector<12x72xf32> to vector<9x72xf32>
    %c0_22 = arith.constant 0 : index
    %c0_23 = arith.constant 0 : index
    %c0_24 = arith.constant 0 : index
    %30 = vector.load %arg6[%c0_22, %c0_23, %c0_24] : memref<4x72x144xf32, #tpu.memory_space<vmem>>, vector<1x72x144xf32>
    %31 = vector.shape_cast %30 : vector<1x72x144xf32> to vector<72x144xf32>
    %cst_25 = arith.constant dense<0.000000e+00> : vector<9x144xf32>
    %32 = tpu.matmul %29, %31, %cst_25 {dimension_numbers = #tpu.dot_dimension_numbers<[1], [0], [0], [1], [0, 0, 1, 1], [], []>} : vector<9x72xf32>, vector<72x144xf32>, vector<9x144xf32> -> vector<9x144xf32>
    %33 = vector.extract_strided_slice %28 {offsets = [1, 0], sizes = [9, 72], strides = [1, 1]} : vector<12x72xf32> to vector<9x72xf32>
    %c1_26 = arith.constant 1 : index
    %c0_27 = arith.constant 0 : index
    %c0_28 = arith.constant 0 : index
    %34 = vector.load %arg6[%c1_26, %c0_27, %c0_28] : memref<4x72x144xf32, #tpu.memory_space<vmem>>, vector<1x72x144xf32>
    %35 = vector.shape_cast %34 : vector<1x72x144xf32> to vector<72x144xf32>
    %cst_29 = arith.constant dense<0.000000e+00> : vector<9x144xf32>
    %36 = tpu.matmul %33, %35, %cst_29 {dimension_numbers = #tpu.dot_dimension_numbers<[1], [0], [0], [1], [0, 0, 1, 1], [], []>} : vector<9x72xf32>, vector<72x144xf32>, vector<9x144xf32> -> vector<9x144xf32>
    %37 = arith.addf %32, %36 : vector<9x144xf32>
    %38 = vector.extract_strided_slice %28 {offsets = [2, 0], sizes = [9, 72], strides = [1, 1]} : vector<12x72xf32> to vector<9x72xf32>
    %c2_30 = arith.constant 2 : index
    %c0_31 = arith.constant 0 : index
    %c0_32 = arith.constant 0 : index
    %39 = vector.load %arg6[%c2_30, %c0_31, %c0_32] : memref<4x72x144xf32, #tpu.memory_space<vmem>>, vector<1x72x144xf32>
    %40 = vector.shape_cast %39 : vector<1x72x144xf32> to vector<72x144xf32>
    %cst_33 = arith.constant dense<0.000000e+00> : vector<9x144xf32>
    %41 = tpu.matmul %38, %40, %cst_33 {dimension_numbers = #tpu.dot_dimension_numbers<[1], [0], [0], [1], [0, 0, 1, 1], [], []>} : vector<9x72xf32>, vector<72x144xf32>, vector<9x144xf32> -> vector<9x144xf32>
    %42 = arith.addf %37, %41 : vector<9x144xf32>
    %43 = vector.extract_strided_slice %28 {offsets = [3, 0], sizes = [9, 72], strides = [1, 1]} : vector<12x72xf32> to vector<9x72xf32>
    %c3_34 = arith.constant 3 : index
    %c0_35 = arith.constant 0 : index
    %c0_36 = arith.constant 0 : index
    %44 = vector.load %arg6[%c3_34, %c0_35, %c0_36] : memref<4x72x144xf32, #tpu.memory_space<vmem>>, vector<1x72x144xf32>
    %45 = vector.shape_cast %44 : vector<1x72x144xf32> to vector<72x144xf32>
    %cst_37 = arith.constant dense<0.000000e+00> : vector<9x144xf32>
    %46 = tpu.matmul %43, %45, %cst_37 {dimension_numbers = #tpu.dot_dimension_numbers<[1], [0], [0], [1], [0, 0, 1, 1], [], []>} : vector<9x72xf32>, vector<72x144xf32>, vector<9x144xf32> -> vector<9x144xf32>
    %47 = arith.addf %42, %46 : vector<9x144xf32>
    %c0_38 = arith.constant 0 : index
    %c0_39 = arith.constant 0 : index
    %48 = vector.load %arg7[%c0_38, %c0_39] : memref<1x144xf32, #tpu.memory_space<vmem>>, vector<1x144xf32>
    %49 = vector.broadcast %48 : vector<1x144xf32> to vector<9x144xf32>
    %50 = arith.addf %47, %49 : vector<9x144xf32>
    %51 = math.tanh %50 : vector<9x144xf32>
    %c0_40 = arith.constant 0 : index
    %c0_41 = arith.constant 0 : index
    %52 = vector.load %arg8[%c0_40, %c0_41] : memref<4x9xf32, #tpu.memory_space<vmem>>, vector<4x9xf32>
    %cst_42 = arith.constant dense<0.000000e+00> : vector<4x144xf32>
    %53 = tpu.matmul %52, %51, %cst_42 {dimension_numbers = #tpu.dot_dimension_numbers<[1], [0], [0], [1], [0, 0, 1, 1], [], []>} : vector<4x9xf32>, vector<9x144xf32>, vector<4x144xf32> -> vector<4x144xf32>
    %c0_43 = arith.constant 0 : index
    %c0_44 = arith.constant 0 : index
    %54 = vector.load %arg9[%c0_43, %c0_44] : memref<144x64xf32, #tpu.memory_space<vmem>>, vector<144x64xf32>
    %cst_45 = arith.constant dense<0.000000e+00> : vector<4x64xf32>
    %55 = tpu.matmul %53, %54, %cst_45 {dimension_numbers = #tpu.dot_dimension_numbers<[1], [0], [0], [1], [0, 0, 1, 1], [], []>} : vector<4x144xf32>, vector<144x64xf32>, vector<4x64xf32> -> vector<4x64xf32>
    %56 = vector.extract_strided_slice %55 {offsets = [0, 0], sizes = [1, 64], strides = [1, 1]} : vector<4x64xf32> to vector<1x64xf32>
    %c0_46 = arith.constant 0 : index
    %c0_47 = arith.constant 0 : index
    %c0_48 = arith.constant 0 : index
    %57 = vector.load %arg10[%c0_46, %c0_47, %c0_48] : memref<4x64x120xf32, #tpu.memory_space<vmem>>, vector<1x64x120xf32>
    %58 = vector.shape_cast %57 : vector<1x64x120xf32> to vector<64x120xf32>
    %cst_49 = arith.constant dense<0.000000e+00> : vector<1x120xf32>
    %59 = tpu.matmul %56, %58, %cst_49 {dimension_numbers = #tpu.dot_dimension_numbers<[1], [0], [0], [1], [0, 0, 1, 1], [], []>} : vector<1x64xf32>, vector<64x120xf32>, vector<1x120xf32> -> vector<1x120xf32>
    %60 = vector.extract_strided_slice %55 {offsets = [1, 0], sizes = [1, 64], strides = [1, 1]} : vector<4x64xf32> to vector<1x64xf32>
    %c1_50 = arith.constant 1 : index
    %c0_51 = arith.constant 0 : index
    %c0_52 = arith.constant 0 : index
    %61 = vector.load %arg10[%c1_50, %c0_51, %c0_52] : memref<4x64x120xf32, #tpu.memory_space<vmem>>, vector<1x64x120xf32>
    %62 = vector.shape_cast %61 : vector<1x64x120xf32> to vector<64x120xf32>
    %cst_53 = arith.constant dense<0.000000e+00> : vector<1x120xf32>
    %63 = tpu.matmul %60, %62, %cst_53 {dimension_numbers = #tpu.dot_dimension_numbers<[1], [0], [0], [1], [0, 0, 1, 1], [], []>} : vector<1x64xf32>, vector<64x120xf32>, vector<1x120xf32> -> vector<1x120xf32>
    %64 = arith.addf %59, %63 : vector<1x120xf32>
    %65 = vector.extract_strided_slice %55 {offsets = [2, 0], sizes = [1, 64], strides = [1, 1]} : vector<4x64xf32> to vector<1x64xf32>
    %c2_54 = arith.constant 2 : index
    %c0_55 = arith.constant 0 : index
    %c0_56 = arith.constant 0 : index
    %66 = vector.load %arg10[%c2_54, %c0_55, %c0_56] : memref<4x64x120xf32, #tpu.memory_space<vmem>>, vector<1x64x120xf32>
    %67 = vector.shape_cast %66 : vector<1x64x120xf32> to vector<64x120xf32>
    %cst_57 = arith.constant dense<0.000000e+00> : vector<1x120xf32>
    %68 = tpu.matmul %65, %67, %cst_57 {dimension_numbers = #tpu.dot_dimension_numbers<[1], [0], [0], [1], [0, 0, 1, 1], [], []>} : vector<1x64xf32>, vector<64x120xf32>, vector<1x120xf32> -> vector<1x120xf32>
    %69 = arith.addf %64, %68 : vector<1x120xf32>
    %70 = vector.extract_strided_slice %55 {offsets = [3, 0], sizes = [1, 64], strides = [1, 1]} : vector<4x64xf32> to vector<1x64xf32>
    %c3_58 = arith.constant 3 : index
    %c0_59 = arith.constant 0 : index
    %c0_60 = arith.constant 0 : index
    %71 = vector.load %arg10[%c3_58, %c0_59, %c0_60] : memref<4x64x120xf32, #tpu.memory_space<vmem>>, vector<1x64x120xf32>
    %72 = vector.shape_cast %71 : vector<1x64x120xf32> to vector<64x120xf32>
    %cst_61 = arith.constant dense<0.000000e+00> : vector<1x120xf32>
    %73 = tpu.matmul %70, %72, %cst_61 {dimension_numbers = #tpu.dot_dimension_numbers<[1], [0], [0], [1], [0, 0, 1, 1], [], []>} : vector<1x64xf32>, vector<64x120xf32>, vector<1x120xf32> -> vector<1x120xf32>
    %74 = arith.addf %69, %73 : vector<1x120xf32>
    %c0_62 = arith.constant 0 : index
    %c0_63 = arith.constant 0 : index
    %75 = vector.load %arg11[%c0_62, %c0_63] : memref<1x120xf32, #tpu.memory_space<vmem>>, vector<1x120xf32>
    %76 = arith.addf %74, %75 : vector<1x120xf32>
    %77 = math.tanh %76 : vector<1x120xf32>
    %c0_64 = arith.constant 0 : index
    %c0_65 = arith.constant 0 : index
    %78 = vector.load %arg12[%c0_64, %c0_65] : memref<120x84xf32, #tpu.memory_space<vmem>>, vector<120x84xf32>
    %cst_66 = arith.constant dense<0.000000e+00> : vector<1x84xf32>
    %79 = tpu.matmul %77, %78, %cst_66 {dimension_numbers = #tpu.dot_dimension_numbers<[1], [0], [0], [1], [0, 0, 1, 1], [], []>} : vector<1x120xf32>, vector<120x84xf32>, vector<1x84xf32> -> vector<1x84xf32>
    %c0_67 = arith.constant 0 : index
    %c0_68 = arith.constant 0 : index
    %80 = vector.load %arg13[%c0_67, %c0_68] : memref<1x84xf32, #tpu.memory_space<vmem>>, vector<1x84xf32>
    %81 = arith.addf %79, %80 : vector<1x84xf32>
    %82 = math.tanh %81 : vector<1x84xf32>
    %c0_69 = arith.constant 0 : index
    %c0_70 = arith.constant 0 : index
    %83 = vector.load %arg14[%c0_69, %c0_70] : memref<84x128xf32, #tpu.memory_space<vmem>>, vector<84x128xf32>
    %cst_71 = arith.constant dense<0.000000e+00> : vector<1x128xf32>
    %84 = tpu.matmul %82, %83, %cst_71 {dimension_numbers = #tpu.dot_dimension_numbers<[1], [0], [0], [1], [0, 0, 1, 1], [], []>} : vector<1x84xf32>, vector<84x128xf32>, vector<1x128xf32> -> vector<1x128xf32>
    %c0_72 = arith.constant 0 : index
    %c0_73 = arith.constant 0 : index
    %85 = vector.load %arg15[%c0_72, %c0_73] : memref<1x128xf32, #tpu.memory_space<vmem>>, vector<1x128xf32>
    %86 = arith.addf %84, %85 : vector<1x128xf32>
    %cst_74 = arith.constant dense<0xFF800000> : vector<1xf32>
    %87 = vector.multi_reduction <maximumf>, %86, %cst_74 [1] : vector<1x128xf32> to vector<1xf32>
    %88 = vector.shape_cast %87 : vector<1xf32> to vector<1x1xf32>
    %89 = vector.broadcast %88 : vector<1x1xf32> to vector<1x128xf32>
    %90 = arith.subf %86, %89 : vector<1x128xf32>
    %91 = math.exp %90 : vector<1x128xf32>
    %cst_75 = arith.constant dense<0.000000e+00> : vector<1xf32>
    %92 = vector.multi_reduction <add>, %91, %cst_75 [1] : vector<1x128xf32> to vector<1xf32>
    %93 = vector.shape_cast %92 : vector<1xf32> to vector<1x1xf32>
    %94 = vector.broadcast %93 : vector<1x1xf32> to vector<1x128xf32>
    %95 = arith.divf %91, %94 : vector<1x128xf32>
    %c0_76 = arith.constant 0 : index
    %c0_77 = arith.constant 0 : index
    %c0_78 = arith.constant 0 : index
    %96 = vector.load %arg16[%c0_76, %c0_77, %c0_78] : memref<1x1x128xf32, #tpu.memory_space<vmem>>, vector<1x1x128xf32>
    %97 = vector.shape_cast %96 : vector<1x1x128xf32> to vector<1x128xf32>
    %98 = vector.shape_cast %95 : vector<1x128xf32> to vector<1x1x128xf32>
    tpu.vector_store %arg16[%c0_76, %c0_77, %c0_78], %98 {strides = array<i32>} : memref<1x1x128xf32, #tpu.memory_space<vmem>>, vector<1x1x128xf32>,
    return
  }
  func.func @transform_0(%arg0: i32) -> (i32, i32, i32) {
    %c0_i32 = arith.constant 0 : i32
    %c0_i32_0 = arith.constant 0 : i32
    %c0_i32_1 = arith.constant 0 : i32
    return %arg0, %c0_i32, %c0_i32_0 : i32, i32, i32
  }
  func.func @transform_1(%arg0: i32) -> (i32, i32, i32) {
    %c0_i32 = arith.constant 0 : i32
    %c0_i32_0 = arith.constant 0 : i32
    %c0_i32_1 = arith.constant 0 : i32
    %c0_i32_2 = arith.constant 0 : i32
    return %c0_i32, %c0_i32_0, %c0_i32_1 : i32, i32, i32
  }
  func.func @transform_2(%arg0: i32) -> (i32, i32) {
    %c0_i32 = arith.constant 0 : i32
    %c0_i32_0 = arith.constant 0 : i32
    %c0_i32_1 = arith.constant 0 : i32
    return %c0_i32, %c0_i32_0 : i32, i32
  }
  func.func @transform_3(%arg0: i32) -> (i32, i32) {
    %c0_i32 = arith.constant 0 : i32
    %c0_i32_0 = arith.constant 0 : i32
    %c0_i32_1 = arith.constant 0 : i32
    return %c0_i32, %c0_i32_0 : i32, i32
  }
  func.func @transform_4(%arg0: i32) -> (i32, i32) {
    %c0_i32 = arith.constant 0 : i32
    %c0_i32_0 = arith.constant 0 : i32
    %c0_i32_1 = arith.constant 0 : i32
    return %c0_i32, %c0_i32_0 : i32, i32
  }
  func.func @transform_5(%arg0: i32) -> (i32, i32, i32) {
    %c0_i32 = arith.constant 0 : i32
    %c0_i32_0 = arith.constant 0 : i32
    %c0_i32_1 = arith.constant 0 : i32
    %c0_i32_2 = arith.constant 0 : i32
    return %c0_i32, %c0_i32_0, %c0_i32_1 : i32, i32, i32
  }
  func.func @transform_6(%arg0: i32) -> (i32, i32) {
    %c0_i32 = arith.constant 0 : i32
    %c0_i32_0 = arith.constant 0 : i32
    %c0_i32_1 = arith.constant 0 : i32
    return %c0_i32, %c0_i32_0 : i32, i32
  }
  func.func @transform_7(%arg0: i32) -> (i32, i32) {
    %c0_i32 = arith.constant 0 : i32
    %c0_i32_0 = arith.constant 0 : i32
    %c0_i32_1 = arith.constant 0 : i32
    return %c0_i32, %c0_i32_0 : i32, i32
  }
  func.func @transform_8(%arg0: i32) -> (i32, i32) {
    %c0_i32 = arith.constant 0 : i32
    %c0_i32_0 = arith.constant 0 : i32
    %c0_i32_1 = arith.constant 0 : i32
    return %c0_i32, %c0_i32_0 : i32, i32
  }
  func.func @transform_9(%arg0: i32) -> (i32, i32, i32) {
    %c0_i32 = arith.constant 0 : i32
    %c0_i32_0 = arith.constant 0 : i32
    %c0_i32_1 = arith.constant 0 : i32
    %c0_i32_2 = arith.constant 0 : i32
    return %c0_i32, %c0_i32_0, %c0_i32_1 : i32, i32, i32
  }
  func.func @transform_10(%arg0: i32) -> (i32, i32) {
    %c0_i32 = arith.constant 0 : i32
    %c0_i32_0 = arith.constant 0 : i32
    %c0_i32_1 = arith.constant 0 : i32
    return %c0_i32, %c0_i32_0 : i32, i32
  }
  func.func @transform_11(%arg0: i32) -> (i32, i32) {
    %c0_i32 = arith.constant 0 : i32
    %c0_i32_0 = arith.constant 0 : i32
    %c0_i32_1 = arith.constant 0 : i32
    return %c0_i32, %c0_i32_0 : i32, i32
  }
  func.func @transform_12(%arg0: i32) -> (i32, i32) {
    %c0_i32 = arith.constant 0 : i32
    %c0_i32_0 = arith.constant 0 : i32
    %c0_i32_1 = arith.constant 0 : i32
    return %c0_i32, %c0_i32_0 : i32, i32
  }
  func.func @transform_13(%arg0: i32) -> (i32, i32) {
    %c0_i32 = arith.constant 0 : i32
    %c0_i32_0 = arith.constant 0 : i32
    %c0_i32_1 = arith.constant 0 : i32
    return %c0_i32, %c0_i32_0 : i32, i32
  }
  func.func @transform_14(%arg0: i32) -> (i32, i32) {
    %c0_i32 = arith.constant 0 : i32
    %c0_i32_0 = arith.constant 0 : i32
    %c0_i32_1 = arith.constant 0 : i32
    return %c0_i32, %c0_i32_0 : i32, i32
  }
  func.func @transform_15(%arg0: i32) -> (i32, i32, i32) {
    %c0_i32 = arith.constant 0 : i32
    %c0_i32_0 = arith.constant 0 : i32
    %c0_i32_1 = arith.constant 0 : i32
    return %arg0, %c0_i32, %c0_i32_0 : i32, i32, i32
  }
}

</mosaic_0001>

<bundles_post_ra>
// kernel: lenet_forward.1
= control target key start
LH: loop header
LB: loop body
LE: loop exit
PB: predicated region body
PF: predicated region fallthrough
CT: control target
= control target key end

     0   :  { %s3944_s0 = inlined_call_operand.vmem [shape: f32[2,28,28], index: 0, kind: input, shape index: {}]   ;;  %s3945_s1 = inlined_call_operand.vmem [shape: f32[4,28,150], index: 1, kind: input, shape index: {}]   ;;  %s3946_s2 = inlined_call_operand.vmem [shape: f32[1,150], index: 2, kind: input, shape index: {}]   ;;  %s3947_s3 = inlined_call_operand.vmem [shape: f32[12,25], index: 3, kind: input, shape index: {}]   ;;  %s3948_s4 = inlined_call_operand.vmem [shape: f32[150,72], index: 4, kind: input, shape index: {}]   ;;  %s3949_s5 = inlined_call_operand.vmem [shape: f32[4,72,144], index: 5, kind: input, shape index: {}]   ;;  %s3950_s6 = inlined_call_operand.vmem [shape: f32[1,144], index: 6, kind: input, shape index: {}]   ;;  %s3951_s7 = inlined_call_operand.vmem [shape: f32[4,9], index: 7, kind: input, shape index: {}]   ;;  %s3952_s8 = inlined_call_operand.vmem [shape: f32[144,64], index: 8, kind: input, shape index: {}]   ;;  %s3953_s9 = inlined_call_operand.vmem [shape: f32[4,64,120], index: 9, kind: input, shape index: {}]   ;;  %s3954_s10 = inlined_call_operand.vmem [shape: f32[1,120], index: 10, kind: input, shape index: {}]   ;;  %s3955_s11 = inlined_call_operand.vmem [shape: f32[120,84], index: 11, kind: input, shape index: {}]   ;;  %s3956_s12 = inlined_call_operand.vmem [shape: f32[1,84], index: 12, kind: input, shape index: {}]   ;;  %s3957_s13 = inlined_call_operand.vmem [shape: f32[84,128], index: 13, kind: input, shape index: {}]   ;;  %s3958_s14 = inlined_call_operand.vmem [shape: f32[1,128], index: 14, kind: input, shape index: {}]   ;;  %s3959_s15 = inlined_call_operand.hbm [shape: f32[2,1,128], index: 15, kind: output, shape index: {}]  }
   0x1   :  { %3965 = sst [smem:[#allocation10_spill]] %s3944_s0 }
   0x2   :  { %20 = vsyncpa [#allocation3], 0 }
   0x3   :  { %22 = vsyncpa [#allocation3 + $0x1], 0  ;;  %s2998_s18 = smov 0   ;;  %s3000_s19 = smov 0  }
   0x4   :  { %s3002_s20 = smov 0   ;;  %s3004_s21 = smov 0  }
   0x5 LB: > { %3966 = sst [smem:[#allocation5_spill]] %s2901_s18  ;;  %s3019_s22 = sadd.s32 4294967295, %s2913_s21   ;;  %s2913_s21 = sphi %s3004_s21, %s3976_s21   ;;  %s2909_s20 = sphi %s3002_s20, %s3978_s20   ;;  %s2905_s19 = sphi %s3000_s19, %s3980_s19   ;;  %s2901_s18 = sphi %s2998_s18, %s3979_s18  }
   0x6   : > { %3967 = sst [smem:[#allocation6_spill]] %s2909_s20  ;;  %s2420_s23 = sadd.s32 4294967294, %s2913_s21  }
   0x7   : > { %s3023_s24 = sadd.s32 1, %s2913_s21   ;;  %s355_s25 = sadd.s32 1, %s2909_s20 }
   0x8   : > { %3968 = sst [smem:[#allocation7_spill]] %s3023_s24  ;;  %s352_s26 = ssub.s32 %s2913_s21, %s3023_s24 }
   0x9   : > { %p365_p0 = scmp.ne.s32.totalorder %s2909_s20, %s2905_s19  ;;  %p353_p1 = scmp.eq.s32.totalorder %s352_s26, 0 }
   0xa   : > { %p366_p2 = scmp.eq.s32.totalorder %s3019_s22, 1  ;;  %p371_p3 = scmp.ne.s32.totalorder %s2905_s19, %s2901_s18 }
   0xb   : > { %p372_p4 = scmp.eq.s32.totalorder %s2420_s23, 1  ;;  %p2423_p7 = scmp.ge.s32.totalorder %s2913_s21, 1 }
   0xc   : > { %s3034_s27 = scalar_select %p353_p1, %s2909_s20, %s355_s25  }
   0xd   : > { %p3036_p5 = por %p366_p2, %p365_p0  ;;  %p3040_p6 = por %p372_p4, %p371_p3 }
   0xe   : > { %3969 = sst [smem:[#allocation8_spill]] %s3034_s27  ;;  %p440_p8 = scmp.lt.s32.totalorder %s2913_s21, 3 }
   0xf   : > { %s3971_s29 = scalar_select %p3040_p6, 1, 0 }
  0x10   : > { %p441_p9 = pnand %p2423_p7, %p440_p8 }
  0x11   : > { %3972 = sst [smem:[#allocation9_spill]] %s3971_s29  ;;  %p487_p10 = scmp.lt.s32.totalorder (!%p441_p9), %s3019_s22, 1 }
  0x12   : > { %444 = sbr.rel (%p441_p9) target bundleno = 2303 (0x8ff), region = 80  ;;  %s3973_s0 = sld [smem:[#allocation10_spill]] (!%p441_p9) }
  0x13   : > { %s2578_s25 = sshll.u32 (!%p441_p9), %s3019_s22, 4  ;;  %s2917_s16 = smov (!%p441_p9), [#allocation2]  }
  0x14   : > { %s2363_s30 = scalar_lea.hbm (!%p441_p9), %s3959_s15, %s2578_s25  ;;  %s2857_s17 = sshll.u32 (!%p441_p9), %s2917_s16, 4  ;;  %s2858_s17 = int_to_ptr.vmem [resolvable:$false] %s2857_s17 }
  0x17   : > { %v2433_v0 = vld [vmem:[%s3945_s1 + $0x78] sm:$0xf]  ;;  %vm534_vm0 = vcmask 1043456   ;;  %v2431_v2 = vld [vmem:[%s3945_s1 + $0x68] sm:$0xff]  ;;  %v2432_v3 = vld [vmem:[%s3945_s1 + $0x70] sm:$0xf] }
  0x18   : > { %v503_v1 = vld [vmem:[%s3945_s1 + $0x38] sm:$0xf]  ;;  %2434 = vmatprep.subr.msk.mxu0 %vm534_vm0, %v2433_v0  ;;  %v502_v4 = vld [vmem:[%s3945_s1 + $0x30] sm:$0xf]  ;;  %v501_v5 = vld [vmem:[%s3945_s1 + $0x28] sm:$0xff]  ;;  %s488_s24 = scalar_select %p487_p10, %s3019_s22, 1 }
  0x19   : > { %2440 = vmatprep.subr.msk.mxu1 %vm534_vm0, %v503_v1  ;;  %2435 = vmatpush1.msk.msra.mxu0 %vm534_vm0, %v2432_v3  ;;  %v2430_v6 = vld [vmem:[%s3945_s1 + $0x60] sm:$0xff]  ;;  %v2429_v8 = vld [vmem:[%s3945_s1 + $0x58] sm:$0xff]  ;;  %v2428_v10 = vld [vmem:[%s3945_s1 + $0x50] sm:$0xff]  ;;  %vm525_vm1 = vcmask 228352   ;;  %v2915_v18 = vmov 0.0   ;;  %vm517_vm2 = vcmask 1046528  }
  0x1a   : > { %2441 = vmatpush1.msk.msra.mxu1 %vm534_vm0, %v502_v4  ;;  %v500_v7 = vld [vmem:[%s3945_s1 + $0x20] sm:$0xff]  ;;  %567 = vmatprep.subr.mxu0 %v2431_v2  ;;  %v499_v9 = vld [vmem:[%s3945_s1 + $0x18] sm:$0xff]  ;;  %v498_v11 = vld [vmem:[%s3945_s1 + $0x10] sm:$0xff]  ;;  %s2581_s23 = sshll.u32 %s488_s24, 5  ;;  %vm870_vm3 = vcmask 1044480   ;;  %vm742_vm4 = vcmask 1045504  }
  0x1b   : > { %670 = vmatprep.subr.mxu1 %v501_v5  ;;  %568 = vmatpush1.msra.mxu0 %v2430_v6  ;;  %v2427_v12 = vld [vmem:[%s3945_s1 + $0x48] sm:$0xff]  ;;  %v2426_v14 = vld [vmem:[%s3945_s1 + $0x40] sm:$0xff]  ;;  %s491_s27 = scalar_lea.vmem %s3973_s0, %s2581_s23  ;;  %v2453_v16 = vld [vmem:[%s3945_s1 + $0xb8] sm:$0xf]  ;;  %vm1026_vm5 = vcmask 1040384   ;;  %vm1019_vm6 = vcmask 203776  }
  0x1c   : > { %671 = vmatpush1.msra.mxu1 %v500_v7  ;;  %v497_v13 = vld [vmem:[%s3945_s1 + $0x8] sm:$0xff]  ;;  %569 = vmatprep.subr.mxu0 %v2429_v8  ;;  %v496_v15 = vld [vmem:[%s3945_s1] sm:$0xff]  ;;  %v2467_v17 = vld [vmem:[%s3945_s1 + $0xf8] sm:$0xf]  ;;  %vm1129_vm7 = vcmask 179200   ;;  %vm1256_vm8 = vcmask 588800  }
  0x1d   : > { %672 = vmatprep.subr.mxu1 %v499_v9  ;;  %570 = vmatpush1.msra.mxu0 %v2428_v10  ;;  %v3110_v19 = vld [vmem:[%s491_s27] sm:$0xff]  ;;  %v3112_v20 = vld [vmem:[%s491_s27 + $0x8] sm:$0xff]  ;;  %v3114_v21 = vld [vmem:[%s491_s27 + $0x10] sm:$0xff]  ;;  %vm1654_vm9 = vcmask 72704   ;;  %vm1753_vm10 = vcmask 130048   ;;  %vm2916_vm11 = vmmov 0  }
  0x1e   : > { %673 = vmatpush1.msra.mxu1 %v498_v11  ;;  %571 = vmatprep.subr.mxu0 %v2427_v12  ;;  %v518_v22 = vrot.slane %v3110_v19, 1  ;;  %v519_v23 = vrot.slane %v3112_v20, 1  ;;  %v521_v24 = vrot.slane %v3114_v21, 1  ;;  %v2466_v25 = vld [vmem:[%s3945_s1 + $0xf0] sm:$0xf]  ;;  %v2451_v29 = vld [vmem:[%s3945_s1 + $0xa8] sm:$0xff] }
  0x1f   : > { %674 = vmatprep.subr.mxu1 %v497_v13  ;;  %572 = vmatpush1.msra.mxu0 %v2426_v14  ;;  %v3125_v26 = vld [vmem:[%s491_s27 + $0x18] sm:$0xf]  ;;  %v2452_v27 = vld [vmem:[%s3945_s1 + $0xb0] sm:$0xf]  ;;  %v2465_v30 = vld [vmem:[%s3945_s1 + $0xe8] sm:$0xff]  ;;  %v871_v41 = vrot.slane %v3110_v19, 3 }
  0x20   : > { %605 = vmatprep.mubr.f32.mxu0 %v2915_v18  ;;  %675 = vmatpush1.msra.mxu1 %v496_v15  ;;  %v520_v28 = vsel %vm517_vm2, %v518_v22, %v519_v23  ;;  %v522_v31 = vsel %vm517_vm2, %v519_v23, %v521_v24  ;;  %v523_v32 = vrot.slane %v3125_v26, 1  ;;  %v2464_v33 = vld [vmem:[%s3945_s1 + $0xe0] sm:$0xff]  ;;  %v2449_v35 = vld [vmem:[%s3945_s1 + $0x98] sm:$0xff]  ;;  %v2462_v38 = vld [vmem:[%s3945_s1 + $0xd0] sm:$0xff]  ;;  %v872_v42 = vrot.slane %v3112_v20, 3  ;;  %s485_s23 = sand.u32 1, %s2905_s19  }
  0x21   : > { %708 = vmatprep.mubr.f32.mxu1 %v2915_v18  ;;  %2454 = vmatprep.subr.msk.mxu0 %vm534_vm0, %v2453_v16  ;;  %v2450_v34 = vld [vmem:[%s3945_s1 + $0xa0] sm:$0xff]  ;;  %v2463_v36 = vld [vmem:[%s3945_s1 + $0xd8] sm:$0xff]  ;;  %v2448_v39 = vld [vmem:[%s3945_s1 + $0x90] sm:$0xff]  ;;  %v743_v46 = vrot.slane %v3110_v19, 2  ;;  %v744_v47 = vrot.slane %v3112_v20, 2  ;;  %v874_v49 = vrot.slane %v3114_v21, 3 }
  0x22   : > { %2442 = vmatmul.mubr.msk.f32.vlgmr.msra.gmra.mxu1 %vm525_vm1, %v3110_v19  ;;  %2468 = vmatprep.subr.msk.mxu1 %vm534_vm0, %v2467_v17  ;;  %v524_v37 = vsel %vm517_vm2, %v521_v24, %v523_v32  ;;  %v2447_v40 = vld [vmem:[%s3945_s1 + $0x88] sm:$0xff]  ;;  %v2446_v44 = vld [vmem:[%s3945_s1 + $0x80] sm:$0xff]  ;;  %v873_v48 = vsel %vm870_vm3, %v871_v41, %v872_v42  ;;  %v746_v51 = vrot.slane %v3114_v21, 2  ;;  %v876_v53 = vrot.slane %v3125_v26, 3  ;;  %v1125_v58 = vld [vmem:[%s3948_s4 + $0x78] sm:$0xff]  ;;  %s486_s20 = scalar_lea.vmem [#allocation2], %s485_s23 }
  0x23   : > { %714 = vmatprep.mubr.f32.mxu1 %v2915_v18  ;;  %2436 = vmatmul.mubr.msk.f32.vlgmr.msra.gmra.mxu0 %vm525_vm1, %v520_v28  ;;  %v2461_v43 = vld [vmem:[%s3945_s1 + $0xc8] sm:$0xff]  ;;  %v2460_v45 = vld [vmem:[%s3945_s1 + $0xc0] sm:$0xff]  ;;  %v745_v50 = vsel %vm742_vm4, %v743_v46, %v744_v47  ;;  %v875_v52 = vsel %vm870_vm3, %v872_v42, %v874_v49  ;;  %v748_v55 = vrot.slane %v3125_v26, 2  ;;  %v1124_v59 = vld [vmem:[%s3948_s4 + $0x70] sm:$0xff]  ;;  %vm1846_vm12 = vcmask 523264   ;;  %s2365_s27 = sshll.u32 %s486_s20, 4  ;;  %s2366_s27 = int_to_ptr.vmem [resolvable:$true] %s2365_s27 }
  0x24   : > { %2469 = vmatpush1.msk.msra.mxu1 %vm534_vm0, %v2466_v25  ;;  %611 = vmatprep.mubr.f32.mxu0 %v2915_v18  ;;  %v747_v54 = vsel %vm742_vm4, %v744_v47, %v746_v51  ;;  %v877_v56 = vsel %vm870_vm3, %v874_v49, %v876_v53  ;;  %v1123_v60 = vld [vmem:[%s3948_s4 + $0x68] sm:$0xff]  ;;  %v1122_v61 = vld [vmem:[%s3948_s4 + $0x60] sm:$0xff]  ;;  %v1121_v62 = vld [vmem:[%s3948_s4 + $0x58] sm:$0xff]  ;;  %vm2176_vm13 = vcmask 982016   ;;  %vm2263_vm14 = vcmask 687104   ;;  %s2353_s18 = scalar_lea.sflag [#allocation3], %s485_s23  ;;  %p2860_p0 = scmp.lt.s32.totalorder %s2366_s27, %s2858_s17 }
  0x25   : > { %2455 = vmatpush1.msk.msra.mxu0 %vm534_vm0, %v2452_v27  ;;  %918 = vmatprep.subr.mxu1 %v2465_v30  ;;  %v749_v57 = vsel %vm742_vm4, %v746_v51, %v748_v55  ;;  %v1120_v63 = vld [vmem:[%s3948_s4 + $0x50] sm:$0xff]  ;;  %v1119_v0 = vld [vmem:[%s3948_s4 + $0x48] sm:$0xff]  ;;  %v1118_v1 = vld [vmem:[%s3948_s4 + $0x40] sm:$0xff]  ;;  %s2853_s24 = scalar_lea.vmem %s2366_s27, 16  ;;  %s2859_s22 = scalar_lea.vmem %s2858_s17, 32 }
  0x26   : > { %2443 = vmatmul.mubr.msk.f32.gmra.mxu1 %vm525_vm1, %v3112_v20  ;;  %790 = vmatprep.subr.mxu0 %v2451_v29  ;;  %v1117_v2 = vld [vmem:[%s3948_s4 + $0x38] sm:$0xff]  ;;  %v1116_v3 = vld [vmem:[%s3948_s4 + $0x30] sm:$0xff]  ;;  %v1115_v4 = vld [vmem:[%s3948_s4 + $0x28] sm:$0xff]  ;;  %p2854_p11 = scmp.ne.s32.totalorder %s2366_s27, %s2853_s24  ;;  %p2861_p1 = scmp.lt.s32.totalorder %s2859_s22, %s2853_s24 }
  0x27   : > { %720 = vmatprep.mubr.f32.mxu1 %v2915_v18  ;;  %2437 = vmatmul.mubr.msk.f32.gmra.mxu0 %vm525_vm1, %v522_v31  ;;  %v1114_v5 = vld [vmem:[%s3948_s4 + $0x20] sm:$0xff]  ;;  %v1113_v6 = vld [vmem:[%s3948_s4 + $0x18] sm:$0xff]  ;;  %v1112_v7 = vld [vmem:[%s3948_s4 + $0x10] sm:$0xff] }
  0x28   : > { %919 = vmatpush1.msra.mxu1 %v2464_v33  ;;  %617 = vmatprep.mubr.f32.mxu0 %v2915_v18  ;;  %v1111_v8 = vld [vmem:[%s3948_s4 + $0x8] sm:$0xff]  ;;  %v1110_v9 = vld [vmem:[%s3948_s4] sm:$0xff]  ;;  %v1128_v10 = vld [vmem:[%s3948_s4 + $0x90] sm:$0x3f]  ;;  %v991_v33 = vlaneseq  ;;  %p2855_p12 = pnand %p2854_p11, %p3036_p5  ;;  %p2862_p2 = por %p2861_p1, %p2860_p0 }
  0x29   : > { %791 = vmatpush1.msra.mxu0 %v2450_v34  ;;  %920 = vmatprep.subr.mxu1 %v2463_v36 }
  0x2a   : > { %2444 = vmatmul.mubr.msk.f32.gmra.mxu1 %vm525_vm1, %v3114_v21  ;;  %792 = vmatprep.subr.mxu0 %v2449_v35  ;;  %p2856_p13 = pneg %p2855_p12 }
  0x2b   : > { %726 = vmatprep.mubr.f32.mxu1 %v2915_v18  ;;  %2438 = vmatmul.mubr.msk.f32.gmra.mxu0 %vm525_vm1, %v524_v37 }
  0x2c   : > { %921 = vmatpush1.msra.mxu1 %v2462_v38  ;;  %623 = vmatprep.mubr.f32.mxu0 %v2915_v18  ;;  %v3291_v38 = vshrl.u32 %v991_v33, 7  ;;  %v2497_v33 = vld [vmem:[%s3949_s5 + $0x110] sm:$0xff]  ;;  %p2863_p3 = pnand %p2862_p2, %p2856_p13 }
  0x2d   : > { %793 = vmatpush1.msra.mxu0 %v2448_v39  ;;  %922 = vmatprep.subr.mxu1 %v2461_v43 }
  0x2e   : > { %2445 = vmatmul.mubr.msk.f32.gmra.mxu1 %vm525_vm1, %v3125_v26  ;;  %794 = vmatprep.subr.mxu0 %v2447_v40  ;;  %v997_v49 = vsub.s32 1, %v3291_v38 }
  0x2f   : > { %795 = vmatpush1.msra.mxu0 %v2446_v44  ;;  %923 = vmatpush1.msra.mxu1 %v2460_v45 }
  0x30   : > { %2439 = vmatmul.mubr.msk.f32.gmra.mxu0 %vm525_vm1, %v523_v32  ;;  %956 = vmatprep.mubr.f32.mxu1 %v2915_v18 }
  0x31   : > { %828 = vmatprep.mubr.f32.mxu0 %v2915_v18  ;;  %1139 = vmatprep.subr.mxu1 %v2915_v18 }
  0x32   : > { %2470 = vmatmul.mubr.msk.f32.vlgmr.msra.gmra.mxu1 %vm525_vm1, %v873_v48  ;;  %v993_v48 = vsub.s32 0, %v3291_v38  ;;  %v1653_v38 = vld [vmem:[%s3951_s7] sm:$0xf] }
  0x33   : > { %962 = vmatprep.mubr.f32.mxu1 %v2915_v18  ;;  %1140 = vmatpush1.msra.mxu1 %v1125_v58 }
  0x34   : > { %2456 = vmatmul.mubr.msk.f32.vlgmr.msra.gmra.mxu0 %vm525_vm1, %v745_v50  ;;  %1141 = vmatprep.subr.mxu1 %v2915_v18 }
  0x35   : > { %834 = vmatprep.mubr.f32.mxu0 %v2915_v18  ;;  %1142 = vmatpush1.msra.mxu1 %v1124_v59 }
  0x36   : > { %2471 = vmatmul.mubr.msk.f32.gmra.mxu1 %vm525_vm1, %v875_v52  ;;  %1143 = vmatprep.subr.mxu1 %v2915_v18 }
  0x37   : > { %968 = vmatprep.mubr.f32.mxu1 %v2915_v18  ;;  %1144 = vmatpush1.msra.mxu1 %v1123_v60 }
  0x38   : > { %2457 = vmatmul.mubr.msk.f32.gmra.mxu0 %vm525_vm1, %v747_v54  ;;  %1145 = vmatprep.subr.mxu1 %v2915_v18 }
  0x39   : > { %840 = vmatprep.mubr.f32.mxu0 %v2915_v18  ;;  %1146 = vmatpush1.msra.mxu1 %v1122_v61 }
  0x3a   : > { %2472 = vmatmul.mubr.msk.f32.gmra.mxu1 %vm525_vm1, %v877_v56  ;;  %1147 = vmatprep.subr.mxu1 %v2915_v18 }
  0x3b   : > { %974 = vmatprep.mubr.f32.mxu1 %v2915_v18  ;;  %1148 = vmatpush1.msra.mxu1 %v1121_v62 }
  0x3c   : > { %2458 = vmatmul.mubr.msk.f32.gmra.mxu0 %vm525_vm1, %v749_v57  ;;  %1149 = vmatprep.subr.mxu1 %v2915_v18 }
  0x3d   : > { %846 = vmatprep.mubr.f32.mxu0 %v2915_v18  ;;  %1150 = vmatpush1.msra.mxu1 %v1120_v63 }
  0x3e   : > { %2473 = vmatmul.mubr.msk.f32.gmra.mxu1 %vm525_vm1, %v876_v53  ;;  %1151 = vmatprep.subr.mxu1 %v2915_v18 }
  0x3f   : > { %1152 = vmatpush1.msra.mxu1 %v1119_v0 }
  0x40   : > { %2459 = vmatmul.mubr.msk.f32.gmra.mxu0 %vm525_vm1, %v748_v55  ;;  %1153 = vmatprep.subr.mxu1 %v2915_v18  ;;  %v989_v55 = vld [vmem:[%s3946_s2] sm:$0x3] }
  0x41   : > { %1097 = vmatprep.mubr.f32.mxu0 %v2915_v18  ;;  %1154 = vmatpush1.msra.mxu1 %v1118_v1 }
  0x42   : > { %1155 = vmatprep.subr.mxu1 %v2915_v18 }
  0x43   : > { %1156 = vmatpush1.msra.mxu1 %v1117_v2  ;;  %v994_v2 = vrot.slane %v989_v55, %v993_v48 }
  0x44   : > { %1157 = vmatprep.subr.mxu1 %v2915_v18 }
  0x45   : > { %1158 = vmatpush1.msra.mxu1 %v1116_v3 }
  0x46   : > { %1159 = vmatprep.subr.mxu1 %v2915_v18 }
  0x47   : > { %1160 = vmatpush1.msra.mxu1 %v1115_v4 }
  0x48   : > { %1161 = vmatprep.subr.mxu1 %v2915_v18 }
  0x49   : > { %1162 = vmatpush1.msra.mxu1 %v1114_v5  ;;  %v998_v5 = vrot.slane %v989_v55, %v997_v49  ;;  %v2515_v55 = vld [vmem:[%s3949_s5 + $0x180] sm:$0xff] }
  0x4a   : > { %1163 = vmatprep.subr.mxu1 %v2915_v18 }
  0x4b   : > { %1164 = vmatpush1.msra.mxu1 %v1113_v6 }
  0x4c   : > { %1165 = vmatprep.subr.mxu1 %v2915_v18 }
  0x4d   : > { %1166 = vmatpush1.msra.mxu1 %v1112_v7 }
  0x4e   : > { %1167 = vmatprep.subr.mxu1 %v2915_v18 }
  0x4f   : > { %1168 = vmatpush1.msra.mxu1 %v1111_v8 }
  0x50   : > { %1169 = vmatprep.subr.mxu1 %v2915_v18 }
  0x51   : > { %1170 = vmatpush1.msra.mxu1 %v1110_v9 }
  0x52   : > { %1197 = vmatprep.subr.mxu1 %v2915_v18 }
  0x53   : > { %2478 = vmatpush2.msk.msra.mxu1 %vm742_vm4, %v1128_v10 }
  0x54   : > { %1199 = vmatprep.subr.mxu1 %v2915_v18 }
  0xe2   : > { %v710_v11 = vpop.f32.mrf.mxu1 }
  0xe3   : > { %v607_v12 = vpop.f32.mrf.mxu0 }
  0xe4   : > { %v712_v13 = vpop.f32.mrf.mxu1  ;;  %v711_v58 = vadd.f32 %v710_v11, %v607_v12 }
  0xe5   : > { %v609_v14 = vpop.f32.mrf.mxu0 }
  0xe6   : > { %v716_v15 = vpop.f32.mrf.mxu1  ;;  %v713_v53 = vadd.f32 %v712_v13, %v609_v14 }
  0xe7   : > { %v613_v16 = vpop.f32.mrf.mxu0 }
  0xe8   : > { %v718_v17 = vpop.f32.mrf.mxu1  ;;  %v717_v47 = vadd.f32 %v716_v15, %v613_v16 }
  0xe9   : > { %v615_v19 = vpop.f32.mrf.mxu0 }
  0xea   : > { %v722_v20 = vpop.f32.mrf.mxu1  ;;  %v719_v44 = vadd.f32 %v718_v17, %v615_v19 }
  0xeb   : > { %v619_v21 = vpop.f32.mrf.mxu0 }
  0xec   : > { %v724_v22 = vpop.f32.mrf.mxu1  ;;  %v723_v42 = vadd.f32 %v722_v20, %v619_v21 }
  0xed   : > { %v621_v23 = vpop.f32.mrf.mxu0 }
  0xee   : > { %v728_v24 = vpop.f32.mrf.mxu1  ;;  %v725_v41 = vadd.f32 %v724_v22, %v621_v23 }
  0xf0   : > { %v625_v25 = vpop.f32.mrf.mxu0  ;;  %v730_v26 = vpop.f32.mrf.mxu1 }
  0xf1   : > { %v729_v45 = vadd.f32 %v728_v24, %v625_v25 }
  0xf2   : > { %v627_v27 = vpop.f32.mrf.mxu0  ;;  %v958_v28 = vpop.f32.mrf.mxu1 }
  0xf3   : > { %v731_v54 = vadd.f32 %v730_v26, %v627_v27  ;;  %v1017_v27 = vld [vmem:[%s3947_s3] sm:$0xff] }
  0xf4   : > { %v830_v29 = vpop.f32.mrf.mxu0  ;;  %v960_v30 = vpop.f32.mrf.mxu1 }
  0xf5   : > { %v853_v1 = vadd.f32 %v830_v29, %v711_v58  ;;  %v1018_v29 = vld [vmem:[%s3947_s3 + $0x8] sm:$0xf] }
  0xf6   : > { %v832_v31 = vpop.f32.mrf.mxu0  ;;  %v964_v32 = vpop.f32.mrf.mxu1  ;;  %v2512_v58 = vld [vmem:[%s3949_s5 + $0x168] sm:$0xff] }
  0xf7   : > { %v854_v61 = vadd.f32 %v832_v31, %v713_v53  ;;  %v981_v13 = vadd.f32 %v958_v28, %v853_v1  ;;  %v1126_v31 = vld [vmem:[%s3948_s4 + $0x80] sm:$0xff]  ;;  %v2516_v53 = vld [vmem:[%s3949_s5 + $0x188] sm:$0xff] }
  0xf8   : > { %v836_v34 = vpop.f32.mrf.mxu0  ;;  %v966_v35 = vpop.f32.mrf.mxu1  ;;  %v2508_v1 = vld [vmem:[%s3949_s5 + $0x148] sm:$0xff] }
  0xf9   : > { %v855_v59 = vadd.f32 %v836_v34, %v717_v47  ;;  %v982_v10 = vadd.f32 %v960_v30, %v854_v61  ;;  %v1001_v19 = vadd.f32 %v994_v2, %v981_v13  ;;  %v1127_v30 = vld [vmem:[%s3948_s4 + $0x88] sm:$0xff]  ;;  %v2519_v47 = vld [vmem:[%s3949_s5 + $0x1a0] sm:$0xff]  ;;  %v2510_v61 = vld [vmem:[%s3949_s5 + $0x158] sm:$0xff] }
  0xfa   : > { %v838_v36 = vpop.f32.mrf.mxu0  ;;  %v970_v37 = vpop.f32.mrf.mxu1  ;;  %1200 = vmatpush2.msra.mxu1 %v1127_v30  ;;  %v2520_v34 = vld [vmem:[%s3949_s5 + $0x1a8] sm:$0xff] }
  0xfb   : > { %v856_v56 = vadd.f32 %v838_v36, %v719_v44  ;;  %v983_v8 = vadd.f32 %v964_v32, %v855_v59  ;;  %v1002_v17 = vadd.f32 %v998_v5, %v982_v10  ;;  %1201 = vmatprep.subr.mxu1 %v2915_v18  ;;  %v2498_v32 = vld [vmem:[%s3949_s5 + $0x118] sm:$0xff]  ;;  %v2495_v36 = vld [vmem:[%s3949_s5 + $0x100] sm:$0xff]  ;;  %v2488_v44 = vld [vmem:[%s3949_s5 + $0xc8] sm:$0xff] }
  0xfc   : > { %v842_v39 = vpop.f32.mrf.mxu0  ;;  %v972_v40 = vpop.f32.mrf.mxu1  ;;  %1202 = vmatpush2.msra.mxu1 %v1126_v31  ;;  %v2511_v59 = vld [vmem:[%s3949_s5 + $0x160] sm:$0xff]  ;;  %v1231_v10 = vld [vmem:[%s3949_s5 + $0x88] sm:$0xff] }
  0xfd   : > { %v857_v50 = vadd.f32 %v842_v39, %v723_v42  ;;  %v984_v6 = vadd.f32 %v966_v35, %v856_v56  ;;  %v1003_v16 = vadd.f32 %v994_v2, %v983_v8  ;;  %1459 = vmatprep.subr.mxu1 %v2520_v34  ;;  %v2496_v35 = vld [vmem:[%s3949_s5 + $0x108] sm:$0xff]  ;;  %v2493_v39 = vld [vmem:[%s3949_s5 + $0xf0] sm:$0xff]  ;;  %v2490_v42 = vld [vmem:[%s3949_s5 + $0xd8] sm:$0xff] }
  0xfe   : > { %v844_v43 = vpop.f32.mrf.mxu0  ;;  %v976_v52 = vpop.f32.mrf.mxu1  ;;  %v2514_v56 = vld [vmem:[%s3949_s5 + $0x178] sm:$0xff]  ;;  %v2481_v8 = vld [vmem:[%s3949_s5 + $0x90] sm:$0xff]  ;;  %v1223_v30 = vld [vmem:[%s3949_s5 + $0x48] sm:$0xff] }
  0xff   : > { %v858_v46 = vadd.f32 %v844_v43, %v725_v41  ;;  %v985_v3 = vadd.f32 %v970_v37, %v857_v50  ;;  %v1004_v15 = vadd.f32 %v998_v5, %v984_v6  ;;  %v2494_v37 = vld [vmem:[%s3949_s5 + $0xf8] sm:$0xff]  ;;  %v2491_v41 = vld [vmem:[%s3949_s5 + $0xe0] sm:$0xff]  ;;  %v2489_v43 = vld [vmem:[%s3949_s5 + $0xd0] sm:$0xff] }
 0x100   : > { %v848_v51 = vpop.f32.mrf.mxu0  ;;  %v978_v4 = vpop.f32.mrf.mxu1  ;;  %v2518_v50 = vld [vmem:[%s3949_s5 + $0x198] sm:$0xff]  ;;  %v1222_v31 = vld [vmem:[%s3949_s5 + $0x40] sm:$0xff]  ;;  %v1219_v34 = vld [vmem:[%s3949_s5 + $0x28] sm:$0xff] }
 0x101   : > { %v859_v57 = vadd.f32 %v848_v51, %v729_v45  ;;  %v986_v62 = vadd.f32 %v972_v40, %v858_v46  ;;  %v1005_v14 = vadd.f32 %v994_v2, %v985_v3  ;;  %v2492_v40 = vld [vmem:[%s3949_s5 + $0xe8] sm:$0xff]  ;;  %v2507_v3 = vld [vmem:[%s3949_s5 + $0x140] sm:$0xff]  ;;  %v2482_v6 = vld [vmem:[%s3949_s5 + $0x98] sm:$0xff] }
 0x102   : > { %v850_v60 = vpop.f32.mrf.mxu0 }
 0x103   : > { %v987_v63 = vadd.f32 %v976_v52, %v859_v57  ;;  %v860_v0 = vadd.f32 %v850_v60, %v731_v54  ;;  %v1006_v11 = vadd.f32 %v998_v5, %v986_v62  ;;  %v2517_v52 = vld [vmem:[%s3949_s5 + $0x190] sm:$0xff]  ;;  %v2487_v60 = vld [vmem:[%s3949_s5 + $0xc0] sm:$0xff]  ;;  %v2486_v62 = vld [vmem:[%s3949_s5 + $0xb8] sm:$0xff] }
 0x104   : > { %v2513_v57 = vld [vmem:[%s3949_s5 + $0x170] sm:$0xff] }
 0x105   : > { %v988_v7 = vadd.f32 %v978_v4, %v860_v0  ;;  %v1007_v9 = vadd.f32 %v994_v2, %v987_v63  ;;  %v2509_v63 = vld [vmem:[%s3949_s5 + $0x150] sm:$0xff]  ;;  %v2484_v2 = vld [vmem:[%s3949_s5 + $0xa8] sm:$0xff]  ;;  %v2483_v4 = vld [vmem:[%s3949_s5 + $0xa0] sm:$0xff] }
 0x106   : > { %v2485_v0 = vld [vmem:[%s3949_s5 + $0xb0] sm:$0xff] }
 0x107   : > { %v1008_v12 = vadd.f32 %v998_v5, %v988_v7  ;;  %v2506_v5 = vld [vmem:[%s3949_s5 + $0x138] sm:$0xff]  ;;  %v2505_v7 = vld [vmem:[%s3949_s5 + $0x130] sm:$0xff] }
 0x109   : > { %2821 = vtanh.f32 %v1008_v12 }
 0x10a   : > { %2823 = vtanh.f32 %v1007_v9  ;;  %v2504_v9 = vld [vmem:[%s3949_s5 + $0x128] sm:$0xff] }
 0x10b   : > { %2825 = vtanh.f32 %v1006_v11  ;;  %v2503_v11 = vld [vmem:[%s3949_s5 + $0x120] sm:$0xff] }
 0x10c   : > { %2827 = vtanh.f32 %v1005_v14 }
 0x10d   : > { %2829 = vtanh.f32 %v1004_v15 }
 0x10e   : > { %2831 = vtanh.f32 %v1003_v16 }
 0x10f   : > { %2833 = vtanh.f32 %v1002_v17 }
 0x110   : > { %2835 = vtanh.f32 %v1001_v19 }
 0x116   : > { %v2822_v20 = vpop.eup %2821 }
 0x117   : > { %v2824_v21 = vpop.eup %2823  ;;  %2474 = vmatprep.subr.msk.mxu0 %vm1026_vm5, %v2822_v20 }
 0x118   : > { %v2826_v22 = vpop.eup %2825  ;;  %2475 = vmatpush1.msk.msra.mxu0 %vm1026_vm5, %v2824_v21  ;;  %v1230_v21 = vld [vmem:[%s3949_s5 + $0x80] sm:$0xff] }
 0x119   : > { %v2828_v23 = vpop.eup %2827  ;;  %1059 = vmatprep.subr.mxu0 %v2826_v22 }
 0x11a   : > { %v2830_v24 = vpop.eup %2829  ;;  %1060 = vmatpush1.msra.mxu0 %v2828_v23 }
 0x11b   : > { %v2832_v25 = vpop.eup %2831  ;;  %1061 = vmatprep.subr.mxu0 %v2830_v24  ;;  %v1229_v24 = vld [vmem:[%s3949_s5 + $0x78] sm:$0xff] }
 0x11c   : > { %v2834_v26 = vpop.eup %2833  ;;  %1062 = vmatpush1.msra.mxu0 %v2832_v25  ;;  %v1228_v25 = vld [vmem:[%s3949_s5 + $0x70] sm:$0xff] }
 0x11d   : > { %v2836_v28 = vpop.eup %2835  ;;  %1063 = vmatprep.subr.mxu0 %v2834_v26  ;;  %v1227_v26 = vld [vmem:[%s3949_s5 + $0x68] sm:$0xff] }
 0x11e   : > { %1064 = vmatpush1.msra.mxu0 %v2836_v28  ;;  %v1225_v28 = vld [vmem:[%s3949_s5 + $0x58] sm:$0xff] }
 0x11f   : > { %2476 = vmatmul.mubr.msk.f32.vlgmr.msra.gmra.mxu0 %vm1019_vm6, %v1017_v27  ;;  %1275 = vmatprep.subr.mxu0 %v2498_v32  ;;  %v1226_v27 = vld [vmem:[%s3949_s5 + $0x60] sm:$0xff]  ;;  %v1221_v32 = vld [vmem:[%s3949_s5 + $0x38] sm:$0xff] }
 0x120   : > { %1103 = vmatprep.mubr.f32.mxu0 %v2915_v18  ;;  %1276 = vmatpush1.msra.mxu0 %v2497_v33  ;;  %v1220_v33 = vld [vmem:[%s3949_s5 + $0x30] sm:$0xff] }
 0x121   : > { %1277 = vmatprep.subr.mxu0 %v2496_v35  ;;  %v1218_v35 = vld [vmem:[%s3949_s5 + $0x20] sm:$0xff] }
 0x122   : > { %1278 = vmatpush1.msra.mxu0 %v2495_v36  ;;  %v1217_v36 = vld [vmem:[%s3949_s5 + $0x18] sm:$0xff] }
 0x123   : > { %2477 = vmatmul.mubr.msk.f32.gmra.mxu0 %vm1019_vm6, %v1018_v29  ;;  %1279 = vmatprep.subr.mxu0 %v2494_v37  ;;  %v1224_v29 = vld [vmem:[%s3949_s5 + $0x50] sm:$0xff] }
 0x124   : > { %1325 = vmatprep.mubr.f32.mxu0 %v2915_v18  ;;  %1280 = vmatpush1.msra.mxu0 %v2493_v39  ;;  %v1216_v37 = vld [vmem:[%s3949_s5 + $0x10] sm:$0xff]  ;;  %v1215_v39 = vld [vmem:[%s3949_s5 + $0x8] sm:$0xff] }
 0x125   : > { %1281 = vmatprep.subr.mxu0 %v2492_v40  ;;  %v1214_v40 = vld [vmem:[%s3949_s5] sm:$0xff] }
 0x126   : > { %1282 = vmatpush1.msra.mxu0 %v2491_v41  ;;  %v2540_v41 = vld [vmem:[%s3949_s5 + $0x238] sm:$0xff] }
 0x127   : > { %1283 = vmatprep.subr.mxu0 %v2490_v42  ;;  %v2539_v42 = vld [vmem:[%s3949_s5 + $0x230] sm:$0xff] }
 0x128   : > { %1284 = vmatpush1.msra.mxu0 %v2489_v43  ;;  %v2538_v43 = vld [vmem:[%s3949_s5 + $0x228] sm:$0xff] }
 0x129   : > { %1285 = vmatprep.subr.mxu0 %v2488_v44  ;;  %v2537_v44 = vld [vmem:[%s3949_s5 + $0x220] sm:$0xff] }
 0x12a   : > { %1286 = vmatpush1.msra.mxu0 %v2487_v60  ;;  %v2524_v60 = vld [vmem:[%s3949_s5 + $0x1b8] sm:$0xff] }
 0x12b   : > { %1287 = vmatprep.subr.mxu0 %v2486_v62 }
 0x12c   : > { %1288 = vmatpush1.msra.mxu0 %v2485_v0 }
 0x12d   : > { %1289 = vmatprep.subr.mxu0 %v2484_v2 }
 0x12e   : > { %1290 = vmatpush1.msra.mxu0 %v2483_v4 }
 0x12f   : > { %1291 = vmatprep.subr.mxu0 %v2482_v6 }
 0x130   : > { %1292 = vmatpush1.msra.mxu0 %v2481_v8 }
 0x131   : > { %1356 = vmatprep.subr.mxu0 %v1231_v10 }
 0x1df   : > { %v1099_v45 = vpop.f32.mrf.mxu0 }
 0x1e1   : > { %v1101_v46 = vpop.f32.mrf.mxu0 }
 0x1e2   : > { %2479 = vmatprep.mubr.msk.f32.mxu1 %vm1129_vm7, %v1101_v46  ;;  %v2535_v46 = vld [vmem:[%s3949_s5 + $0x210] sm:$0xff] }
 0x1e3   : > { %v1105_v51 = vpop.f32.mrf.mxu0  ;;  %1204 = vmatmul.mubr.f32.vlgmr.msra.gmra.mxu1 %v1099_v45  ;;  %v2536_v45 = vld [vmem:[%s3949_s5 + $0x218] sm:$0xff] }
 0x1e4   : > { %1460 = vmatpush1.msra.mxu1 %v2519_v47  ;;  %v2534_v47 = vld [vmem:[%s3949_s5 + $0x208] sm:$0xff] }
 0x1e5   : > { %v1107_v54 = vpop.f32.mrf.mxu0  ;;  %1461 = vmatprep.subr.mxu1 %v2518_v50  ;;  %v2533_v50 = vld [vmem:[%s3949_s5 + $0x200] sm:$0xff] }
 0x1e6   : > { %2480 = vmatprep.mubr.msk.f32.mxu1 %vm1129_vm7, %v1107_v54  ;;  %1462 = vmatpush1.msra.mxu1 %v2517_v52  ;;  %v2531_v52 = vld [vmem:[%s3949_s5 + $0x1f0] sm:$0xff]  ;;  %v2529_v54 = vld [vmem:[%s3949_s5 + $0x1e0] sm:$0xff] }
 0x1e7   : > { %1209 = vmatmul.mubr.f32.gmra.mxu1 %v1105_v51  ;;  %1463 = vmatprep.subr.mxu1 %v2516_v53  ;;  %v2532_v51 = vld [vmem:[%s3949_s5 + $0x1f8] sm:$0xff]  ;;  %v2530_v53 = vld [vmem:[%s3949_s5 + $0x1e8] sm:$0xff] }
 0x1e8   : > { %1464 = vmatpush1.msra.mxu1 %v2515_v55  ;;  %1509 = vmatprep.mubr.f32.mxu1 %v2915_v18  ;;  %v2528_v55 = vld [vmem:[%s3949_s5 + $0x1d8] sm:$0xff] }
 0x1e9   : > { %1465 = vmatprep.subr.mxu1 %v2514_v56  ;;  %v2527_v56 = vld [vmem:[%s3949_s5 + $0x1d0] sm:$0xff] }
 0x1ea   : > { %1466 = vmatpush1.msra.mxu1 %v2513_v57  ;;  %v2526_v57 = vld [vmem:[%s3949_s5 + $0x1c8] sm:$0xff] }
 0x1eb   : > { %1467 = vmatprep.subr.mxu1 %v2512_v58  ;;  %v2525_v58 = vld [vmem:[%s3949_s5 + $0x1c0] sm:$0xff] }
 0x1ec   : > { %1468 = vmatpush1.msra.mxu1 %v2511_v59 }
 0x1ed   : > { %1469 = vmatprep.subr.mxu1 %v2510_v61  ;;  %v2523_v61 = vld [vmem:[%s3949_s5 + $0x1b0] sm:$0xff] }
 0x1ee   : > { %1470 = vmatpush1.msra.mxu1 %v2509_v63 }
 0x1ef   : > { %1471 = vmatprep.subr.mxu1 %v2508_v1 }
 0x1f0   : > { %1472 = vmatpush1.msra.mxu1 %v2507_v3 }
 0x1f1   : > { %1473 = vmatprep.subr.mxu1 %v2506_v5 }
 0x1f2   : > { %1474 = vmatpush1.msra.mxu1 %v2505_v7 }
 0x1f3   : > { %1475 = vmatprep.subr.mxu1 %v2504_v9 }
 0x1f4   : > { %1476 = vmatpush1.msra.mxu1 %v2503_v11 }
 0x2a3   : > { %v3431_v12 = vpop.f32.mrf.mxu1 }
 0x2a4   : > { %v1253_v15 = vrot.slane %v3431_v12, 1  ;;  %v1438_v16 = vrot.slane %v3431_v12, 2  ;;  %v1545_v62 = vrot.slane %v3431_v12, 3 }
 0x2a5   : > { %v1207_v13 = vpop.f32.mrf.mxu1 }
 0x2a7   : > { %v3433_v14 = vpop.f32.mrf.mxu1 }
 0x2a8   : > { %v1254_v17 = vrot.slane %v3433_v14, 1  ;;  %v1439_v19 = vrot.slane %v3433_v14, 2  ;;  %v1546_v59 = vrot.slane %v3433_v14, 3 }
 0x2a9   : > { %v1212_v20 = vpop.f32.mrf.mxu1 }
 0x2aa   : > { %v1255_v22 = vsel %vm517_vm2, %v1253_v15, %v1254_v17  ;;  %v1440_v23 = vsel %vm742_vm4, %v1438_v16, %v1439_v19  ;;  %v1547_v63 = vsel %vm870_vm3, %v1545_v62, %v1546_v59  ;;  %v2551_v62 = vld [vmem:[%s3953_s9 + $0x60] sm:$0xff] }
 0x2ab   : > { %2499 = vmatmul.mubr.msk.f32.vlgmr.msra.gmra.mxu0 %vm1256_vm8, %v1255_v22  ;;  %2521 = vmatmul.mubr.msk.f32.vlgmr.msra.gmra.mxu1 %vm1256_vm8, %v1440_v23 }
 0x2ac   : > { %1357 = vmatpush1.msra.mxu0 %v1230_v21  ;;  %1331 = vmatprep.mubr.f32.mxu0 %v2915_v18 }
 0x2ad   : > { %1358 = vmatprep.subr.mxu0 %v1229_v24  ;;  %1515 = vmatprep.mubr.f32.mxu1 %v2915_v18 }
 0x2ae   : > { %1359 = vmatpush1.msra.mxu0 %v1228_v25 }
 0x2af   : > { %1360 = vmatprep.subr.mxu0 %v1227_v26  ;;  %2500 = vmatmul.mubr.msk.f32.gmra.mxu0 %vm1256_vm8, %v1254_v17  ;;  %v1633_v17 = vld [vmem:[%s3950_s6] sm:$0x3] }
 0x2b0   : > { %1361 = vmatpush1.msra.mxu0 %v1226_v27  ;;  %2522 = vmatmul.mubr.msk.f32.gmra.mxu1 %vm1256_vm8, %v1439_v19  ;;  %v1642_v25 = vrot.slane %v1633_v17, %v997_v49 }
 0x2b1   : > { %1362 = vmatprep.subr.mxu0 %v1225_v28  ;;  %1406 = vmatprep.mubr.f32.mxu0 %v2915_v18 }
 0x2b2   : > { %1363 = vmatpush1.msra.mxu0 %v1224_v29  ;;  %1728 = vmatprep.mubr.f32.mxu1 %v2915_v18  ;;  %v1638_v29 = vrot.slane %v1633_v17, %v993_v48 }
 0x2b3   : > { %1364 = vmatprep.subr.mxu0 %v1223_v30 }
 0x2b4   : > { %1365 = vmatpush1.msra.mxu0 %v1222_v31 }
 0x2b5   : > { %1366 = vmatprep.subr.mxu0 %v1221_v32 }
 0x2b6   : > { %1367 = vmatpush1.msra.mxu0 %v1220_v33 }
 0x2b7   : > { %1368 = vmatprep.subr.mxu0 %v1219_v34 }
 0x2b8   : > { %1369 = vmatpush1.msra.mxu0 %v1218_v35 }
 0x2b9   : > { %1370 = vmatprep.subr.mxu0 %v1217_v36 }
 0x2ba   : > { %1371 = vmatpush1.msra.mxu0 %v1216_v37 }
 0x2bb   : > { %1372 = vmatprep.subr.mxu0 %v1215_v39  ;;  %v1750_v39 = vld [vmem:[%s3952_s8 + $0x78] sm:$0xff] }
 0x2bc   : > { %1373 = vmatpush1.msra.mxu0 %v1214_v40  ;;  %v1749_v40 = vld [vmem:[%s3952_s8 + $0x70] sm:$0xff] }
 0x2bd   : > { %2501 = vmatmul.mubr.msk.f32.vlgmr.msra.gmra.mxu0 %vm1256_vm8, %v3431_v12  ;;  %1566 = vmatprep.subr.mxu0 %v2540_v41  ;;  %v1748_v41 = vld [vmem:[%s3952_s8 + $0x68] sm:$0xff] }
 0x2be   : > { %1567 = vmatpush1.msra.mxu0 %v2539_v42  ;;  %1412 = vmatprep.mubr.f32.mxu0 %v2915_v18  ;;  %v1747_v42 = vld [vmem:[%s3952_s8 + $0x60] sm:$0xff] }
 0x2bf   : > { %1568 = vmatprep.subr.mxu0 %v2538_v43  ;;  %v1746_v43 = vld [vmem:[%s3952_s8 + $0x58] sm:$0xff] }
 0x2c0   : > { %1569 = vmatpush1.msra.mxu0 %v2537_v44  ;;  %v1745_v44 = vld [vmem:[%s3952_s8 + $0x50] sm:$0xff] }
 0x2c1   : > { %2502 = vmatmul.mubr.msk.f32.gmra.mxu0 %vm1256_vm8, %v3433_v14  ;;  %1570 = vmatprep.subr.mxu0 %v2536_v45  ;;  %v1744_v45 = vld [vmem:[%s3952_s8 + $0x48] sm:$0xff] }
 0x2c2   : > { %1571 = vmatpush1.msra.mxu0 %v2535_v46  ;;  %1616 = vmatprep.mubr.f32.mxu0 %v2915_v18  ;;  %v1743_v46 = vld [vmem:[%s3952_s8 + $0x40] sm:$0xff] }
 0x2c3   : > { %1572 = vmatprep.subr.mxu0 %v2534_v47  ;;  %v1742_v47 = vld [vmem:[%s3952_s8 + $0x38] sm:$0xff] }
 0x2c4   : > { %1573 = vmatpush1.msra.mxu0 %v2533_v50  ;;  %v1741_v50 = vld [vmem:[%s3952_s8 + $0x30] sm:$0xff] }
 0x2c5   : > { %1574 = vmatprep.subr.mxu0 %v2532_v51  ;;  %v1740_v51 = vld [vmem:[%s3952_s8 + $0x28] sm:$0xff] }
 0x2c6   : > { %1575 = vmatpush1.msra.mxu0 %v2531_v52  ;;  %v1739_v52 = vld [vmem:[%s3952_s8 + $0x20] sm:$0xff] }
 0x2c7   : > { %1576 = vmatprep.subr.mxu0 %v2530_v53  ;;  %v1738_v53 = vld [vmem:[%s3952_s8 + $0x18] sm:$0xff] }
 0x2c8   : > { %1577 = vmatpush1.msra.mxu0 %v2529_v54  ;;  %v1737_v54 = vld [vmem:[%s3952_s8 + $0x10] sm:$0xff] }
 0x2c9   : > { %1578 = vmatprep.subr.mxu0 %v2528_v55  ;;  %v1736_v55 = vld [vmem:[%s3952_s8 + $0x8] sm:$0xff] }
 0x2ca   : > { %1579 = vmatpush1.msra.mxu0 %v2527_v56  ;;  %v1735_v56 = vld [vmem:[%s3952_s8] sm:$0xff] }
 0x2cb   : > { %1580 = vmatprep.subr.mxu0 %v2526_v57  ;;  %v1752_v57 = vld [vmem:[%s3952_s8 + $0x88] sm:$0xff] }
 0x2cc   : > { %1581 = vmatpush1.msra.mxu0 %v2525_v58  ;;  %v1751_v58 = vld [vmem:[%s3952_s8 + $0x80] sm:$0xff] }
 0x2cd   : > { %1582 = vmatprep.subr.mxu0 %v2524_v60  ;;  %v2553_v60 = vld [vmem:[%s3953_s9 + $0x70] sm:$0xff] }
 0x2ce   : > { %1583 = vmatpush1.msra.mxu0 %v2523_v61  ;;  %v2552_v61 = vld [vmem:[%s3953_s9 + $0x68] sm:$0xff] }
 0x2cf   : > { %2541 = vmatmul.mubr.msk.f32.vlgmr.msra.gmra.mxu0 %vm1256_vm8, %v1547_v63  ;;  %2646 = vmatprep.subr.mxu0 %v2915_v18  ;;  %v2550_v63 = vld [vmem:[%s3953_s9 + $0x58] sm:$0xff] }
 0x2d0   : > { %1622 = vmatprep.mubr.f32.mxu0 %v2915_v18 }
 0x2d3   : > { %2542 = vmatmul.mubr.msk.f32.gmra.mxu0 %vm1256_vm8, %v1546_v59  ;;  %v2554_v59 = vld [vmem:[%s3953_s9 + $0x78] sm:$0xff] }
 0x2d4   : > { %2647 = vmatpush3.msra.mxu0 %v2554_v59  ;;  %2662 = vmatprep.mubr.msk.f32.mxu0 %vm2916_vm11, %v2915_v18 }
 0x2d5   : > { %2648 = vmatprep.subr.mxu0 %v2915_v18 }
 0x2d6   : > { %2649 = vmatpush3.msra.mxu0 %v2553_v60 }
 0x2d7   : > { %2650 = vmatprep.subr.mxu0 %v2915_v18 }
 0x2d8   : > { %2651 = vmatpush3.msra.mxu0 %v2552_v61  ;;  %v2157_v61 = vld [vmem:[%s3954_s10] sm:$0x1] }
 0x2d9   : > { %2652 = vmatprep.subr.mxu0 %v2915_v18 }
 0x2da   : > { %2653 = vmatpush3.msra.mxu0 %v2551_v62 }
 0x2db   : > { %2654 = vmatprep.subr.mxu0 %v2915_v18 }
 0x2dc   : > { %2655 = vmatpush3.msra.mxu0 %v2550_v63 }
 0x2dd   : > { %2656 = vmatprep.subr.mxu0 %v2915_v18 }
 0x36b   : > { %v1327_v0 = vpop.f32.mrf.mxu0  ;;  %v1511_v6 = vpop.f32.mrf.mxu1 }
 0x36d   : > { %v1329_v1 = vpop.f32.mrf.mxu0  ;;  %v1513_v8 = vpop.f32.mrf.mxu1 }
 0x36f   : > { %v1333_v2 = vpop.f32.mrf.mxu0 }
 0x370   : > { %v1517_v12 = vpop.f32.mrf.mxu1 }
 0x371   : > { %v1335_v3 = vpop.f32.mrf.mxu0 }
 0x372   : > { %v1519_v21 = vpop.f32.mrf.mxu1 }
 0x37d   : > { %v1408_v4 = vpop.f32.mrf.mxu0 }
 0x37e   : > { %v1409_v13 = vadd.f32 %v1408_v4, %v1327_v0  ;;  %v2549_v0 = vld [vmem:[%s3953_s9 + $0x50] sm:$0xff]  ;;  %v2564_v4 = vld [vmem:[%s3953_s9 + $0xb8] sm:$0xff] }
 0x37f   : > { %v1410_v5 = vpop.f32.mrf.mxu0  ;;  %2657 = vmatpush3.msra.mxu0 %v2549_v0 }
 0x380   : > { %v1411_v10 = vadd.f32 %v1410_v5, %v1329_v1  ;;  %v1522_v22 = vadd.f32 %v1511_v6, %v1409_v13  ;;  %v2548_v1 = vld [vmem:[%s3953_s9 + $0x48] sm:$0xff]  ;;  %2658 = vmatprep.subr.mxu0 %v2915_v18  ;;  %v2563_v5 = vld [vmem:[%s3953_s9 + $0xb0] sm:$0xff] }
 0x381   : > { %v1414_v7 = vpop.f32.mrf.mxu0  ;;  %2659 = vmatpush3.msra.mxu0 %v2548_v1  ;;  %v2562_v6 = vld [vmem:[%s3953_s9 + $0xa8] sm:$0xff] }
 0x382   : > { %v1415_v11 = vadd.f32 %v1414_v7, %v1333_v2  ;;  %v1523_v19 = vadd.f32 %v1513_v8, %v1411_v10  ;;  %2660 = vmatprep.subr.mxu0 %v2915_v18  ;;  %v2561_v7 = vld [vmem:[%s3953_s9 + $0xa0] sm:$0xff]  ;;  %v2560_v8 = vld [vmem:[%s3953_s9 + $0x98] sm:$0xff] }
 0x383   : > { %v1416_v9 = vpop.f32.mrf.mxu0  ;;  %v2547_v10 = vld [vmem:[%s3953_s9 + $0x40] sm:$0xff] }
 0x384   : > { %v1417_v15 = vadd.f32 %v1416_v9, %v1335_v3  ;;  %v1524_v20 = vadd.f32 %v1517_v12, %v1415_v11  ;;  %v2559_v9 = vld [vmem:[%s3953_s9 + $0x90] sm:$0xff]  ;;  %v2558_v11 = vld [vmem:[%s3953_s9 + $0x88] sm:$0xff]  ;;  %2661 = vmatpush3.msra.mxu0 %v2547_v10  ;;  %v2557_v12 = vld [vmem:[%s3953_s9 + $0x80] sm:$0xff] }
 0x385   : > { %2665 = vmatprep.subr.mxu0 %v2915_v18  ;;  %v2251_v10 = vld [vmem:[%s3957_s13] sm:$0xff] }
 0x386   : > { %v1525_v27 = vadd.f32 %v1519_v21, %v1417_v15  ;;  %v1831_v21 = vld [vmem:[%s3953_s9 + $0x20] sm:$0xff] }
 0x38f   : > { %v1618_v14 = vpop.f32.mrf.mxu0 }
 0x390   : > { %v1629_v28 = vadd.f32 %v1618_v14, %v1522_v22  ;;  %v1830_v22 = vld [vmem:[%s3953_s9 + $0x18] sm:$0xff] }
 0x391   : > { %v1620_v16 = vpop.f32.mrf.mxu0 }
 0x392   : > { %v1630_v24 = vadd.f32 %v1620_v16, %v1523_v19  ;;  %v1645_v35 = vadd.f32 %v1638_v29, %v1629_v28  ;;  %v1834_v16 = vld [vmem:[%s3953_s9 + $0x38] sm:$0xff]  ;;  %v1833_v19 = vld [vmem:[%s3953_s9 + $0x30] sm:$0xff]  ;;  %v2571_v28 = vld [vmem:[%s3953_s9 + $0xe8] sm:$0xff] }
 0x393   : > { %v1624_v23 = vpop.f32.mrf.mxu0 }
 0x394   : > { %v1631_v26 = vadd.f32 %v1624_v23, %v1524_v20  ;;  %v1646_v33 = vadd.f32 %v1642_v25, %v1630_v24  ;;  %v1832_v20 = vld [vmem:[%s3953_s9 + $0x28] sm:$0xff]  ;;  %v1829_v23 = vld [vmem:[%s3953_s9 + $0x10] sm:$0xff] }
 0x395   : > { %v1626_v30 = vpop.f32.mrf.mxu0  ;;  %v1828_v24 = vld [vmem:[%s3953_s9 + $0x8] sm:$0xff] }
 0x396   : > { %v1632_v31 = vadd.f32 %v1626_v30, %v1525_v27  ;;  %v1647_v32 = vadd.f32 %v1638_v29, %v1631_v26  ;;  %v2573_v26 = vld [vmem:[%s3953_s9 + $0xf8] sm:$0xff]  ;;  %v2572_v27 = vld [vmem:[%s3953_s9 + $0xf0] sm:$0xff]  ;;  %v2570_v29 = vld [vmem:[%s3953_s9 + $0xe0] sm:$0xff] }
 0x397   : > { %v2569_v30 = vld [vmem:[%s3953_s9 + $0xd8] sm:$0xff] }
 0x398   : > { %v1648_v34 = vadd.f32 %v1642_v25, %v1632_v31  ;;  %v1827_v25 = vld [vmem:[%s3953_s9] sm:$0xff]  ;;  %v2568_v31 = vld [vmem:[%s3953_s9 + $0xd0] sm:$0xff] }
 0x39a   : > { %2837 = vtanh.f32 %v1648_v34 }
 0x39b   : > { %2839 = vtanh.f32 %v1647_v32  ;;  %v2567_v32 = vld [vmem:[%s3953_s9 + $0xc8] sm:$0xff] }
 0x39c   : > { %2841 = vtanh.f32 %v1646_v33  ;;  %v2566_v33 = vld [vmem:[%s3953_s9 + $0xc0] sm:$0xff] }
 0x39d   : > { %2843 = vtanh.f32 %v1645_v35  ;;  %v2174_v35 = vld [vmem:[%s3955_s11 + $0x70] sm:$0xff] }
 0x3a7   : > { %v2838_v36 = vpop.eup %2837 }
 0x3a8   : > { %v2840_v37 = vpop.eup %2839  ;;  %2543 = vmatprep.subr.msk.mxu1 %vm1026_vm5, %v2838_v36  ;;  %v2173_v36 = vld [vmem:[%s3955_s11 + $0x68] sm:$0xff] }
 0x3a9   : > { %v2842_v49 = vpop.eup %2841  ;;  %2544 = vmatpush1.msk.msra.mxu1 %vm1026_vm5, %v2840_v37  ;;  %v2172_v37 = vld [vmem:[%s3955_s11 + $0x60] sm:$0xff] }
 0x3aa   : > { %v2844_v48 = vpop.eup %2843  ;;  %1694 = vmatprep.subr.mxu1 %v2842_v49  ;;  %v2171_v49 = vld [vmem:[%s3955_s11 + $0x58] sm:$0xff] }
 0x3ab   : > { %1695 = vmatpush1.msra.mxu1 %v2844_v48  ;;  %v2169_v48 = vld [vmem:[%s3955_s11 + $0x48] sm:$0xff] }
 0x3ac   : > { %2545 = vmatmul.mubr.msk.f32.vlgmr.msra.gmra.mxu1 %vm1654_vm9, %v1653_v38  ;;  %1757 = vmatprep.subr.mxu1 %v2915_v18  ;;  %v2170_v38 = vld [vmem:[%s3955_s11 + $0x50] sm:$0xff] }
 0x3ad   : > { %1758 = vmatpush1.msra.mxu1 %v1750_v39  ;;  %v2168_v39 = vld [vmem:[%s3955_s11 + $0x40] sm:$0xff] }
 0x3ae   : > { %1759 = vmatprep.subr.mxu1 %v2915_v18 }
 0x3af   : > { %1760 = vmatpush1.msra.mxu1 %v1749_v40  ;;  %v2167_v40 = vld [vmem:[%s3955_s11 + $0x38] sm:$0xff] }
 0x3b0   : > { %1761 = vmatprep.subr.mxu1 %v2915_v18 }
 0x3b1   : > { %1762 = vmatpush1.msra.mxu1 %v1748_v41  ;;  %v2166_v41 = vld [vmem:[%s3955_s11 + $0x30] sm:$0xff] }
 0x3b2   : > { %1763 = vmatprep.subr.mxu1 %v2915_v18 }
 0x3b3   : > { %1764 = vmatpush1.msra.mxu1 %v1747_v42  ;;  %v2165_v42 = vld [vmem:[%s3955_s11 + $0x28] sm:$0xff] }
 0x3b4   : > { %1765 = vmatprep.subr.mxu1 %v2915_v18 }
 0x3b5   : > { %1766 = vmatpush1.msra.mxu1 %v1746_v43  ;;  %v2164_v43 = vld [vmem:[%s3955_s11 + $0x20] sm:$0xff] }
 0x3b6   : > { %1767 = vmatprep.subr.mxu1 %v2915_v18 }
 0x3b7   : > { %1768 = vmatpush1.msra.mxu1 %v1745_v44  ;;  %v2163_v44 = vld [vmem:[%s3955_s11 + $0x18] sm:$0xff] }
 0x3b8   : > { %1769 = vmatprep.subr.mxu1 %v2915_v18 }
 0x3b9   : > { %1770 = vmatpush1.msra.mxu1 %v1744_v45  ;;  %v2162_v45 = vld [vmem:[%s3955_s11 + $0x10] sm:$0xff] }
 0x3ba   : > { %1771 = vmatprep.subr.mxu1 %v2915_v18 }
 0x3bb   : > { %1772 = vmatpush1.msra.mxu1 %v1743_v46  ;;  %v2161_v46 = vld [vmem:[%s3955_s11 + $0x8] sm:$0xff] }
 0x3bc   : > { %1773 = vmatprep.subr.mxu1 %v2915_v18 }
 0x3bd   : > { %1774 = vmatpush1.msra.mxu1 %v1742_v47  ;;  %v2160_v47 = vld [vmem:[%s3955_s11] sm:$0xff] }
 0x3be   : > { %1775 = vmatprep.subr.mxu1 %v2915_v18 }
 0x3bf   : > { %1776 = vmatpush1.msra.mxu1 %v1741_v50  ;;  %v2261_v50 = vld [vmem:[%s3957_s13 + $0x50] sm:$0xf] }
 0x3c0   : > { %1777 = vmatprep.subr.mxu1 %v2915_v18 }
 0x3c1   : > { %1778 = vmatpush1.msra.mxu1 %v1740_v51  ;;  %v2260_v51 = vld [vmem:[%s3957_s13 + $0x48] sm:$0xff] }
 0x3c2   : > { %1779 = vmatprep.subr.mxu1 %v2915_v18 }
 0x3c3   : > { %1780 = vmatpush1.msra.mxu1 %v1739_v52 }
 0x3c4   : > { %1781 = vmatprep.subr.mxu1 %v2915_v18 }
 0x3c5   : > { %1782 = vmatpush1.msra.mxu1 %v1738_v53 }
 0x3c6   : > { %1783 = vmatprep.subr.mxu1 %v2915_v18 }
 0x3c7   : > { %1784 = vmatpush1.msra.mxu1 %v1737_v54 }
 0x3c8   : > { %1785 = vmatprep.subr.mxu1 %v2915_v18 }
 0x3c9   : > { %1786 = vmatpush1.msra.mxu1 %v1736_v55 }
 0x3ca   : > { %1787 = vmatprep.subr.mxu1 %v2915_v18 }
 0x3cb   : > { %1788 = vmatpush1.msra.mxu1 %v1735_v56 }
 0x3cc   : > { %1817 = vmatprep.subr.mxu1 %v2915_v18 }
 0x3cd   : > { %1818 = vmatpush2.msra.mxu1 %v1752_v57 }
 0x3ce   : > { %1819 = vmatprep.subr.mxu1 %v2915_v18 }
 0x3cf   : > { %1820 = vmatpush2.msra.mxu1 %v1751_v58 }
 0x3d0   : > { %2684 = vmatprep.subr.mxu1 %v2915_v18 }
 0x46c   : > { %v1730_v2 = vpop.f32.mrf.mxu1 }
 0x46e   : > { %v1732_v3 = vpop.f32.mrf.mxu1 }
 0x46f   : > { %2546 = vmatprep.mubr.msk.f32.mxu1 %vm1753_vm10, %v1732_v3  ;;  %v2258_v3 = vld [vmem:[%s3957_s13 + $0x38] sm:$0xff] }
 0x470   : > { %1822 = vmatmul.mubr.f32.vlgmr.msra.gmra.mxu1 %v1730_v2  ;;  %v2259_v2 = vld [vmem:[%s3957_s13 + $0x40] sm:$0xff] }
 0x471   : > { %2685 = vmatpush3.msra.mxu1 %v2564_v4  ;;  %2700 = vmatprep.mubr.msk.f32.mxu1 %vm2916_vm11, %v2915_v18  ;;  %v2257_v4 = vld [vmem:[%s3957_s13 + $0x30] sm:$0xff] }
 0x472   : > { %2686 = vmatprep.subr.mxu1 %v2915_v18 }
 0x473   : > { %2687 = vmatpush3.msra.mxu1 %v2563_v5  ;;  %v2256_v5 = vld [vmem:[%s3957_s13 + $0x28] sm:$0xff] }
 0x474   : > { %2688 = vmatprep.subr.mxu1 %v2915_v18 }
 0x475   : > { %2689 = vmatpush3.msra.mxu1 %v2562_v6  ;;  %v2255_v6 = vld [vmem:[%s3957_s13 + $0x20] sm:$0xff] }
 0x476   : > { %2690 = vmatprep.subr.mxu1 %v2915_v18 }
 0x477   : > { %2691 = vmatpush3.msra.mxu1 %v2561_v7  ;;  %v2254_v7 = vld [vmem:[%s3957_s13 + $0x18] sm:$0xff] }
 0x478   : > { %2692 = vmatprep.subr.mxu1 %v2915_v18 }
 0x479   : > { %2693 = vmatpush3.msra.mxu1 %v2560_v8  ;;  %v2253_v8 = vld [vmem:[%s3957_s13 + $0x10] sm:$0xff] }
 0x47a   : > { %2694 = vmatprep.subr.mxu1 %v2915_v18 }
 0x47b   : > { %2695 = vmatpush3.msra.mxu1 %v2559_v9  ;;  %v2252_v9 = vld [vmem:[%s3957_s13 + $0x8] sm:$0xff] }
 0x47c   : > { %2696 = vmatprep.subr.mxu1 %v2915_v18 }
 0x47d   : > { %2697 = vmatpush3.msra.mxu1 %v2558_v11  ;;  %v2175_v11 = vld [vmem:[%s3956_s12] sm:$0x1] }
 0x47e   : > { %2698 = vmatprep.subr.mxu1 %v2915_v18 }
 0x47f   : > { %2699 = vmatpush3.msra.mxu1 %v2557_v12 }
 0x480   : > { %2722 = vmatprep.subr.mxu1 %v2915_v18 }
 0x530   : > { %v1823_v13 = vpop.f32.mrf.mxu1 }
 0x531   : > { %v1845_v14 = vrot.slane %v1823_v13, 1  ;;  %v2000_v15 = vrot.slane %v1823_v13, 2  ;;  %v2083_v34 = vrot.slane %v1823_v13, 3 }
 0x532   : > { %v1825_v17 = vpop.f32.mrf.mxu1 }
 0x533   : > { %2663 = vmatmul.mubr.msk.f32.vlgmr.msra.gmra.mxu0 %vm1846_vm12, %v1845_v14  ;;  %2701 = vmatmul.mubr.msk.f32.vlgmr.msra.gmra.mxu1 %vm1846_vm12, %v2000_v15 }
 0x534   : > { %2666 = vmatpush3.msra.mxu0 %v1834_v16  ;;  %2681 = vmatprep.mubr.msk.f32.mxu0 %vm2916_vm11, %v2915_v18  ;;  %v2262_v16 = vld [vmem:[%s3958_s14] sm:$0x1] }
 0x535   : > { %2667 = vmatprep.subr.mxu0 %v2915_v18  ;;  %2752 = vmatprep.mubr.msk.f32.mxu1 %vm2916_vm11, %v2915_v18 }
 0x536   : > { %2668 = vmatpush3.msra.mxu0 %v1833_v19  ;;  %2723 = vmatpush3.msra.mxu1 %v2174_v35 }
 0x537   : > { %2669 = vmatprep.subr.mxu0 %v2915_v18  ;;  %2724 = vmatprep.subr.mxu1 %v2915_v18 }
 0x538   : > { %2670 = vmatpush3.msra.mxu0 %v1832_v20  ;;  %2725 = vmatpush3.msra.mxu1 %v2173_v36 }
 0x539   : > { %2671 = vmatprep.subr.mxu0 %v2915_v18  ;;  %2726 = vmatprep.subr.mxu1 %v2915_v18 }
 0x53a   : > { %2672 = vmatpush3.msra.mxu0 %v1831_v21  ;;  %2727 = vmatpush3.msra.mxu1 %v2172_v37 }
 0x53b   : > { %2673 = vmatprep.subr.mxu0 %v2915_v18  ;;  %2728 = vmatprep.subr.mxu1 %v2915_v18 }
 0x53c   : > { %2674 = vmatpush3.msra.mxu0 %v1830_v22  ;;  %2729 = vmatpush3.msra.mxu1 %v2171_v49 }
 0x53d   : > { %2675 = vmatprep.subr.mxu0 %v2915_v18  ;;  %2730 = vmatprep.subr.mxu1 %v2915_v18 }
 0x53e   : > { %2676 = vmatpush3.msra.mxu0 %v1829_v23  ;;  %2731 = vmatpush3.msra.mxu1 %v2170_v38 }
 0x53f   : > { %2677 = vmatprep.subr.mxu0 %v2915_v18  ;;  %2732 = vmatprep.subr.mxu1 %v2915_v18 }
 0x540   : > { %2678 = vmatpush3.msra.mxu0 %v1828_v24  ;;  %2733 = vmatpush3.msra.mxu1 %v2169_v48 }
 0x541   : > { %2679 = vmatprep.subr.mxu0 %v2915_v18  ;;  %2734 = vmatprep.subr.mxu1 %v2915_v18 }
 0x542   : > { %2680 = vmatpush3.msra.mxu0 %v1827_v25  ;;  %2735 = vmatpush3.msra.mxu1 %v2168_v39 }
 0x543   : > { %2682 = vmatmul.mubr.msk.f32.vlgmr.msra.gmra.mxu0 %vm1846_vm12, %v1823_v13  ;;  %2703 = vmatprep.subr.mxu0 %v2915_v18 }
 0x544   : > { %2704 = vmatpush3.msra.mxu0 %v2573_v26  ;;  %2719 = vmatprep.mubr.msk.f32.mxu0 %vm2916_vm11, %v2915_v18 }
 0x545   : > { %2705 = vmatprep.subr.mxu0 %v2915_v18  ;;  %2736 = vmatprep.subr.mxu1 %v2915_v18 }
 0x546   : > { %2706 = vmatpush3.msra.mxu0 %v2572_v27  ;;  %2737 = vmatpush3.msra.mxu1 %v2167_v40 }
 0x547   : > { %2707 = vmatprep.subr.mxu0 %v2915_v18  ;;  %2738 = vmatprep.subr.mxu1 %v2915_v18 }
 0x548   : > { %2708 = vmatpush3.msra.mxu0 %v2571_v28  ;;  %2739 = vmatpush3.msra.mxu1 %v2166_v41 }
 0x549   : > { %2709 = vmatprep.subr.mxu0 %v2915_v18  ;;  %2740 = vmatprep.subr.mxu1 %v2915_v18 }
 0x54a   : > { %2710 = vmatpush3.msra.mxu0 %v2570_v29  ;;  %2741 = vmatpush3.msra.mxu1 %v2165_v42 }
 0x54b   : > { %2711 = vmatprep.subr.mxu0 %v2915_v18  ;;  %2742 = vmatprep.subr.mxu1 %v2915_v18 }
 0x54c   : > { %2712 = vmatpush3.msra.mxu0 %v2569_v30  ;;  %2743 = vmatpush3.msra.mxu1 %v2164_v43 }
 0x54d   : > { %2713 = vmatprep.subr.mxu0 %v2915_v18  ;;  %2744 = vmatprep.subr.mxu1 %v2915_v18 }
 0x54e   : > { %2714 = vmatpush3.msra.mxu0 %v2568_v31  ;;  %2745 = vmatpush3.msra.mxu1 %v2163_v44 }
 0x54f   : > { %2715 = vmatprep.subr.mxu0 %v2915_v18  ;;  %2746 = vmatprep.subr.mxu1 %v2915_v18 }
 0x550   : > { %2716 = vmatpush3.msra.mxu0 %v2567_v32  ;;  %2747 = vmatpush3.msra.mxu1 %v2162_v45 }
 0x551   : > { %2717 = vmatprep.subr.mxu0 %v2915_v18  ;;  %2748 = vmatprep.subr.mxu1 %v2915_v18 }
 0x552   : > { %2718 = vmatpush3.msra.mxu0 %v2566_v33  ;;  %2749 = vmatpush3.msra.mxu1 %v2161_v46 }
 0x553   : > { %2720 = vmatmul.mubr.msk.f32.vlgmr.msra.gmra.mxu0 %vm1846_vm12, %v2083_v34  ;;  %2755 = vmatprep.subr.mxu0 %v2915_v18 }
 0x554   : > { %2777 = vmatprep.mubr.msk.f32.mxu0 %vm2916_vm11, %v2915_v18  ;;  %2750 = vmatprep.subr.mxu1 %v2915_v18 }
 0x555   : > { %2751 = vmatpush3.msra.mxu1 %v2160_v47  ;;  %2756 = vmatpush3.msk.msra.mxu0 %vm534_vm0, %v2261_v50 }
 0x556   : > { %2757 = vmatprep.subr.mxu0 %v2915_v18 }
 0x557   : > { %2758 = vmatpush3.msra.mxu0 %v2260_v51 }
 0x558   : > { %2759 = vmatprep.subr.mxu0 %v2915_v18 }
 0x559   : > { %2760 = vmatpush3.msra.mxu0 %v2259_v2 }
 0x55a   : > { %2761 = vmatprep.subr.mxu0 %v2915_v18 }
 0x55b   : > { %2762 = vmatpush3.msra.mxu0 %v2258_v3 }
 0x55c   : > { %2763 = vmatprep.subr.mxu0 %v2915_v18 }
 0x55d   : > { %2764 = vmatpush3.msra.mxu0 %v2257_v4 }
 0x55e   : > { %2765 = vmatprep.subr.mxu0 %v2915_v18 }
 0x55f   : > { %2766 = vmatpush3.msra.mxu0 %v2256_v5 }
 0x560   : > { %2767 = vmatprep.subr.mxu0 %v2915_v18 }
 0x561   : > { %2768 = vmatpush3.msra.mxu0 %v2255_v6 }
 0x562   : > { %2769 = vmatprep.subr.mxu0 %v2915_v18 }
 0x563   : > { %2770 = vmatpush3.msra.mxu0 %v2254_v7 }
 0x564   : > { %2771 = vmatprep.subr.mxu0 %v2915_v18 }
 0x565   : > { %2772 = vmatpush3.msra.mxu0 %v2253_v8 }
 0x566   : > { %2773 = vmatprep.subr.mxu0 %v2915_v18 }
 0x567   : > { %2774 = vmatpush3.msra.mxu0 %v2252_v9 }
 0x568   : > { %2775 = vmatprep.subr.mxu0 %v2915_v18 }
 0x569   : > { %2776 = vmatpush3.msra.mxu0 %v2251_v10 }
 0x5f3   : > { %v1915_v52 = vpop.f32.mrf.mxu0  ;;  %v2069_v53 = vpop.f32.mrf.mxu1 }
 0x5f5   : > { %v2664_v54 = vpop.f32.mrf.mxu0  ;;  %v2702_v55 = vpop.f32.mrf.mxu1 }
 0x603   : > { %v1987_v56 = vpop.f32.mrf.mxu0 }
 0x604   : > { %v1988_v58 = vadd.f32 %v1987_v56, %v1915_v52 }
 0x605   : > { %v2683_v57 = vpop.f32.mrf.mxu0 }
 0x606   : > { %v2073_v59 = vadd.f32 %v2069_v53, %v1988_v58 }
 0x613   : > { %v2152_v60 = vpop.f32.mrf.mxu0 }
 0x614   : > { %v2156_v62 = vadd.f32 %v2152_v60, %v2073_v59 }
 0x615   : > { %v2721_v63 = vpop.f32.mrf.mxu0 }
 0x616   : > { %v2158_v0 = vadd.f32 %v2157_v61, %v2156_v62 }
 0x618   : > { %2845 = vtanh.f32 %v2158_v0 }
 0x625   : > { %v2846_v1 = vpop.eup %2845 }
 0x626   : > { %2753 = vmatmul.mubr.msk.f32.vlgmr.msra.gmra.mxu1 %vm2176_vm13, %v2846_v1 }
 0x6e6   : > { %v2246_v12 = vpop.f32.mrf.mxu1 }
 0x6e7   : > { %v2247_v13 = vadd.f32 %v2246_v12, %v2175_v11 }
 0x6e8   : > { %v2754_v14 = vpop.f32.mrf.mxu1 }
 0x6e9   : > { %2847 = vtanh.f32 %v2247_v13 }
 0x6f6   : > { %v2848_v15 = vpop.eup %2847 }
 0x6f7   : > { %2778 = vmatmul.mubr.msk.f32.vlgmr.msra.gmra.mxu0 %vm2263_vm14, %v2848_v15 }
 0x7b7   : > { %v2336_v17 = vpop.f32.mrf.mxu0 }
 0x7b8   : > { %v2337_v18 = vadd.f32 %v2336_v17, %v2262_v16 }
 0x7b9   : > { %v2779_v19 = vpop.f32.mrf.mxu0 }
 0x7ba   : > { %v2340_v20 = vsel %vm1026_vm5, %v2337_v18, -inf }
 0x7bb   : > { %2341 = vmax.xlane.f32.xlu0 %v2340_v20 }
 0x844   : > { %v2342_v21 = vpop.xlane.xlu0 %2341 }
 0x845   : > { %v2343_v22 = vsub.f32 %v2337_v18, %v2342_v21 }
 0x847   : > { %v2344_v23 = vmul.f32 1.442695, %v2343_v22 }
 0x849   : > { %2849 = vpow2.f32 %v2344_v23 }
 0x856   : > { %v2850_v24 = vpop.eup %2849 }
 0x857   : > { %v2346_v25 = vsel %vm1026_vm5, %v2850_v24, 0.0 }
 0x858   : > { %2347 = vadd.xlane.f32.xlu0 %v2346_v25 }
 0x8e1   : > { %v2348_v26 = vpop.xlane.xlu0 %2347 }
 0x8e2   : > { %2851 = vrcp.f32 %v2348_v26 }
 0x8ef   : > { %v2852_v27 = vpop.eup %2851 }
 0x8f0   : > { %v2350_v28 = vmul.f32 %v2852_v27, %v2850_v24 }
 0x8f2   : > { %2351 = vst [vmem:[%s486_s20] sm:$0x1] %v2350_v28 }
 0x8f3   : > { %2866 = shalt.err (!%p2863_p3)
}
 0x8f4   : > { %s2867_s0 = scalar_lea.hbm %s2363_s30, 16  ;;  %s2871_s20 = scalar_lea.hbm %s3959_s15, 32 }
 0x8f5   : > { %p2868_p4 = scmp.ne.s32.totalorder %s2363_s30, %s2867_s0  ;;  %p2872_p9 = scmp.lt.s32.totalorder %s2363_s30, %s3959_s15 }
 0x8f6   : > { %p2873_p10 = scmp.lt.s32.totalorder %s2871_s20, %s2867_s0 }
 0x8f7   : > { %p2869_p7 = pnand %p2868_p4, %p3036_p5 }
 0x8f8   : > { %p2874_p11 = por %p2873_p10, %p2872_p9 }
 0x8f9   : > { %p2870_p8 = pneg %p2869_p7 }
 0x8fb   : > { %p2875_p12 = pnand %p2874_p11, %p2870_p8 }
 0x8fd   : > { %2878 = shalt.err (!%p2875_p12)
}
 0x8fe   : > { %2780 = dma.vmem_to_hbm [thread:$0]  (%p3036_p5), %s2366_s27, 16, %s2363_s30, %s2353_s18  }
 0x8ff PF: > { %s3974_s24 = sld [smem:[#allocation5_spill]]  ;;  %p2786_p13 = scmp.ge.s32.totalorder %s2913_s21, 2 }
 0x901   : > { %p2783_p0 = pnand %p2786_p13, %p3040_p6 }
 0x903   : > { %p2784_p1 = pneg %p2783_p0 }
 0x905   : > { %s2377_s17 = sand.u32 1, %s3974_s24  }
 0x906   : > { %s2378_s22 = scalar_lea.sflag [#allocation3], %s2377_s17 }
 0x907   : > { %2896 = dma.done.wait (%p2784_p1), %s2378_s22, 16  }
 0x908   : > { %2898 = vsyncadd (%p2784_p1), %s2378_s22, 4294967280  ;;  %s3976_s21 = sld [smem:[#allocation7_spill]]  ;;  %s3979_s18 = smov %s2905_s19 }
 0x909   : > { %s3977_s0 = sld [smem:[#allocation6_spill]] }
 0x90a   : > { %s3978_s20 = sld [smem:[#allocation8_spill]] }
 0x90e   : > { %p25_p2 = scmp.ge.s32.totalorder %s3976_s21, 4  }
 0x90f   : > { %s3980_s19 = smov %s3977_s0 }
 0x910   :  { %27 = sbr.rel (!%p25_p2) target bundleno = 5 (0x5), region = 124 }
 0x915   :  { %2382 = vsyncpa [#allocation3], 1 }
 0x916   :  { %2384 = vsyncpa [#allocation3 + $0x1], 1 }

</bundles_post_ra>
